<compile_context>
chip_gen: v7x
topology: tpu7x:2x2x1
jax: 0.10.0
libtpu: 0.0.40
codegen_flags: <defaults>
</compile_context>

<pallas_src>
import functools

import jax
import jax.numpy as jnp
from jax.experimental import pallas as pl
from jax.experimental.pallas import tpu as pltpu

NUM_CLASSES = 18          # len(COLORS)
NUM_FEATURES = 256        # stand-in for EfficientNet-B0's 1280 channels
HIDDEN = 512              # Linear(num_features, 512)
NPAD = 128                # fused torso+legs head padded to a lane-dense width
BATCH_TILE = 8            # batch elements per grid step (multiple of 8)


def _head_kernel(feat_ref, w_att_ref, b_att_ref, w1_ref, b1_ref,
                 wc_ref, bc_ref, out_ref):
    """One grid step == one batch tile.  feat_ref: (TB, HW, C) bf16."""
    # Upcast once: elementwise attention/pool math stays f32 (v5e has no bf16
    # VALU); bf16 was only the HBM/VMEM transport format.
    feat = feat_ref[...].astype(jnp.float32)                   # (TB, HW, C)

    # Spatial attention: 1x1 conv (C -> 1) + sigmoid, as a VPU multiply +
    # cross-lane (XLU) reduce instead of a degenerate single-column matmul.
    att_logits = jnp.sum(feat * w_att_ref[...], axis=-1, keepdims=True)
    att = jax.nn.sigmoid(att_logits + b_att_ref[0])            # (TB, HW, 1)

    # Attention-weighted features + AdaptiveAvgPool2d(1) (mean over HW rows).
    # TODO(synk): if profiling shows this VPU/XLU path saturates (v6e at the
    # real C=1280), switch to a fused weighted reduce einsum('bq,bqc->bc').
    pooled = jnp.mean(feat * att, axis=1)                       # (TB, C) f32

    # Linear(C, HIDDEN) + ReLU  (Dropout layers are identity in eval mode).
    # Activations kept f32; bf16 weights upcast in-kernel (tiny VPU cast).
    h = jnp.dot(pooled, w1_ref[...].astype(jnp.float32),
                preferred_element_type=jnp.float32) + b1_ref[...]
    h = jnp.maximum(h, 0.0)                                     # (TB, HIDDEN)

    # Fused torso+legs classifiers: one lane-dense (HIDDEN, 128) matmul.
    logits = jnp.dot(h, wc_ref[...].astype(jnp.float32),
                     preferred_element_type=jnp.float32) + bc_ref[...]
    out_ref[...] = logits                                       # (TB, NPAD)


def prepare_head_params(w_att, b_att, w1, b1, wt, bt, wl, bl):
    """One-time weight prep (call at init, not per forward)."""
    C = w_att.shape[0]
    nc = wt.shape[1]
    w_att_row = w_att.reshape(1, C).astype(jnp.float32)
    b_att_s = b_att.reshape(1).astype(jnp.float32)              # 1-D SMEM scalar

    # Fuse the two classifier heads, zero-pad to 128 output lanes so the final
    # matmul + store are lane-dense; the zero pad keeps the wrapper slice exact.
    wc = (jnp.zeros((HIDDEN, NPAD), jnp.float32)
          .at[:, :nc].set(wt).at[:, nc:2 * nc].set(wl))
    bc = (jnp.zeros((1, NPAD), jnp.float32)
          .at[:, :nc].set(bt.reshape(-1)).at[:, nc:2 * nc].set(bl.reshape(-1)))

    # bf16 weights halve their HBM->VMEM bytes; accumulation/activations stay f32.
    return (w_att_row, b_att_s,
            w1.astype(jnp.bfloat16), b1.astype(jnp.float32),
            wc.astype(jnp.bfloat16), bc)


def improved_color_classifier_head(features_nchw, prep, *,
                                   num_classes=NUM_CLASSES,
                                   batch_tile=BATCH_TILE):
    """features_nchw: (B, C, Hf, Wf) float32 backbone feature map."""
    B, C, H, W = features_nchw.shape
    HW = H * W
    TB = batch_tile
    Bp = ((B + TB - 1) // TB) * TB          # pad batch to a multiple of TB
    w_att_row, b_att_s, w1_bf, b1, wc_bf, bc = prep

    # NCHW -> (B, HW, C) with the bf16 cast fused into the relayout so the
    # transpose write is half-size; channels ride the 128-lane axis in-kernel.
    # TODO(synk): if the backbone were ported too, emit NHWC bf16 directly and
    # drop this wrapper-side relayout pass entirely.
    feat3d = (jnp.transpose(features_nchw, (0, 2, 3, 1))
              .reshape(B, HW, C).astype(jnp.bfloat16))
    if Bp != B:
        feat3d = jnp.pad(feat3d, ((0, Bp - B), (0, 0), (0, 0)))

    cost = pl.CostEstimate(
        flops=Bp * (4 * HW * C + 2 * C * HIDDEN + 2 * HIDDEN * NPAD),
        transcendentals=Bp * HW,
        bytes_accessed=(feat3d.size * 2 + w_att_row.size * 4
                        + w1_bf.size * 2 + b1.size * 4
                        + wc_bf.size * 2 + bc.size * 4 + Bp * NPAD * 4),
    )

    # Constant-index weights/biases: single-buffered (no wasted double-buffer
    # VMEM; matters at the real C=1280 under v7x's 64 MiB VMEM).
    def const(shape):
        return pl.BlockSpec(shape, lambda b: (0,) * len(shape),
                            pipeline_mode=pl.Buffered(1))

    out = pl.pallas_call(
        _head_kernel,
        out_shape=jax.ShapeDtypeStruct((Bp, NPAD), jnp.float32),
        grid=(Bp // TB,),
        in_specs=[
            pl.BlockSpec((TB, HW, C), lambda b: (b, 0, 0)),      # feature tile (bf16)
            const((1, C)),                                       # w_att row (f32)
            pl.BlockSpec(memory_space=pltpu.MemorySpace.SMEM),   # b_att (1,) scalar
            const((C, HIDDEN)),                                  # w1 (bf16)
            const((1, HIDDEN)),                                  # b1 (f32)
            const((HIDDEN, NPAD)),                               # fused head W (bf16)
            const((1, NPAD)),                                    # fused head bias
        ],
        out_specs=pl.BlockSpec((TB, NPAD), lambda b: (b, 0)),
        compiler_params=pltpu.CompilerParams(
            dimension_semantics=("parallel",),   # >=2 steps -> v7x 2-TC split
            # 32 MiB is plenty here; re-derive tile size / limit per generation
            # (v7x: 64 MiB physical) when scaling to the real C=1280 backbone.
            vmem_limit_bytes=32 * 1024 * 1024),
        cost_estimate=cost,
    )(feat3d, w_att_row, b_att_s, w1_bf, b1, wc_bf, bc)

    return out[:B, :num_classes], out[:B, num_classes:2 * num_classes]


def _reference_head(features_nchw, params):
    """Pure-JAX f32 reference matching the PyTorch forward (eval mode)."""
    w_att, b_att, w1, b1, wt, bt, wl, bl = params
    att = jax.nn.sigmoid(
        jnp.einsum('bchw,c->bhw', features_nchw, w_att[:, 0])[:, None]
        + b_att[0, 0])                                      # (B,1,H,W)
    attended = features_nchw * att
    pooled = attended.mean(axis=(2, 3))                     # (B,C)
    h = jnp.maximum(pooled @ w1 + b1[0], 0.0)
    return h @ wt + bt[0], h @ wl + bl[0]


def _make_params(key):
    ks = jax.random.split(key, 8)
    scale = 0.05
    w_att = scale * jax.random.normal(ks[0], (NUM_FEATURES, 1), jnp.float32)
    b_att = scale * jax.random.normal(ks[1], (1, 1), jnp.float32)
    w1 = scale * jax.random.normal(ks[2], (NUM_FEATURES, HIDDEN), jnp.float32)
    b1 = scale * jax.random.normal(ks[3], (1, HIDDEN), jnp.float32)
    wt = scale * jax.random.normal(ks[4], (HIDDEN, NUM_CLASSES), jnp.float32)
    bt = scale * jax.random.normal(ks[5], (1, NUM_CLASSES), jnp.float32)
    wl = scale * jax.random.normal(ks[6], (HIDDEN, NUM_CLASSES), jnp.float32)
    bl = scale * jax.random.normal(ks[7], (1, NUM_CLASSES), jnp.float32)
    return (w_att, b_att, w1, b1, wt, bt, wl, bl)


if __name__ == "__main__":
    key = jax.random.PRNGKey(0)
    k_feat, k_par = jax.random.split(key)

    # Stand-in backbone feature map (output of EfficientNet-B0 .features).
    # B=12 is not a multiple of the batch tile, exercising the padding path;
    # padded B=16 -> 2 grid steps (keeps v7x's dual-TC split alive).
    B, C, H, W = 12, NUM_FEATURES, 8, 8
    feats = jax.random.normal(k_feat, (B, C, H, W), jnp.float32)
    params = _make_params(k_par)

    prep = prepare_head_params(*params)          # one-time weight prep
    head = jax.jit(improved_color_classifier_head,
                   static_argnames=("num_classes", "batch_tile"))

    torso, legs = jax.block_until_ready(head(feats, prep))

    # Correctness check against a plain-JAX f32 reference of the same head.
    ref_t, ref_l = _reference_head(feats, params)
    assert torso.shape == (B, NUM_CLASSES) and legs.shape == (B, NUM_CLASSES)
    assert jnp.allclose(torso, ref_t, atol=2e-2, rtol=2e-2), \
        float(jnp.max(jnp.abs(torso - ref_t)))
    assert jnp.allclose(legs, ref_l, atol=2e-2, rtol=2e-2), \
        float(jnp.max(jnp.abs(legs - ref_l)))

    print("KERNEL_OK")
</pallas_src>

<mosaic_0001>
module attributes {stable_mosaic.version = 11 : i64} {
  func.func @_head_kernel(%arg0: i32, %arg1: memref<8x64x256xbf16, #tpu.memory_space<vmem>>, %arg2: memref<1x256xf32, #tpu.memory_space<vmem>>, %arg3: memref<1xf32, #tpu.memory_space<smem>>, %arg4: memref<256x512xbf16, #tpu.memory_space<vmem>>, %arg5: memref<1x512xf32, #tpu.memory_space<vmem>>, %arg6: memref<512x128xbf16, #tpu.memory_space<vmem>>, %arg7: memref<1x128xf32, #tpu.memory_space<vmem>>, %arg8: memref<8x128xf32, #tpu.memory_space<vmem>>) attributes {dimension_semantics = [#tpu.dimension_semantics<parallel>], iteration_bounds = array<i64: 2>, scalar_prefetch = 0 : i64, scratch_operands = 0 : i64, tpu.core_type = #tpu.core_type<tc>, window_params = [{transform_indices = @transform_0, window_bounds = array<i64: 8, 64, 256>}, {pipeline_mode = #tpu.pipeline_mode<synchronous>, transform_indices = @transform_1, window_bounds = array<i64: 1, 256>}, {transform_indices = @transform_2, window_bounds = array<i64: 1>}, {pipeline_mode = #tpu.pipeline_mode<synchronous>, transform_indices = @transform_3, window_bounds = array<i64: 256, 512>}, {pipeline_mode = #tpu.pipeline_mode<synchronous>, transform_indices = @transform_4, window_bounds = array<i64: 1, 512>}, {pipeline_mode = #tpu.pipeline_mode<synchronous>, transform_indices = @transform_5, window_bounds = array<i64: 512, 128>}, {pipeline_mode = #tpu.pipeline_mode<synchronous>, transform_indices = @transform_6, window_bounds = array<i64: 1, 128>}, {transform_indices = @transform_7, window_bounds = array<i64: 8, 128>}]} {
    %c0 = arith.constant 0 : index
    %c0_0 = arith.constant 0 : index
    %c0_1 = arith.constant 0 : index
    %0 = vector.load %arg1[%c0, %c0_0, %c0_1] : memref<8x64x256xbf16, #tpu.memory_space<vmem>>, vector<8x64x256xbf16>
    %1 = arith.extf %0 : vector<8x64x256xbf16> to vector<8x64x256xf32>
    %c0_2 = arith.constant 0 : index
    %c0_3 = arith.constant 0 : index
    %2 = vector.load %arg2[%c0_2, %c0_3] : memref<1x256xf32, #tpu.memory_space<vmem>>, vector<1x256xf32>
    %3 = vector.shape_cast %2 : vector<1x256xf32> to vector<1x1x256xf32>
    %4 = vector.broadcast %3 : vector<1x1x256xf32> to vector<8x64x256xf32>
    %5 = arith.mulf %1, %4 : vector<8x64x256xf32>
    %cst = arith.constant dense<0.000000e+00> : vector<8x64xf32>
    %6 = vector.multi_reduction <add>, %5, %cst [2] : vector<8x64x256xf32> to vector<8x64xf32>
    %7 = vector.shape_cast %6 : vector<8x64xf32> to vector<8x64x1xf32>
    %c0_4 = arith.constant 0 : index
    %8 = memref.load %arg3[%c0_4] : memref<1xf32, #tpu.memory_space<smem>>
    %9 = vector.broadcast %8 : f32 to vector<8x64x1xf32>
    %10 = arith.addf %7, %9 : vector<8x64x1xf32>
    %11 = arith.negf %10 : vector<8x64x1xf32>
    %12 = math.exp %11 : vector<8x64x1xf32>
    %cst_5 = arith.constant 1.000000e+00 : f32
    %13 = vector.broadcast %cst_5 : f32 to vector<8x64x1xf32>
    %14 = arith.addf %13, %12 : vector<8x64x1xf32>
    %15 = arith.divf %13, %14 : vector<8x64x1xf32>
    %16 = vector.broadcast %15 : vector<8x64x1xf32> to vector<8x64x256xf32>
    %17 = arith.mulf %1, %16 : vector<8x64x256xf32>
    %cst_6 = arith.constant dense<0.000000e+00> : vector<8x256xf32>
    %18 = vector.multi_reduction <add>, %17, %cst_6 [1] : vector<8x64x256xf32> to vector<8x256xf32>
    %cst_7 = arith.constant 6.400000e+01 : f32
    %19 = vector.broadcast %cst_7 : f32 to vector<8x256xf32>
    %20 = arith.divf %18, %19 : vector<8x256xf32>
    %c0_8 = arith.constant 0 : index
    %c0_9 = arith.constant 0 : index
    %21 = vector.load %arg4[%c0_8, %c0_9] : memref<256x512xbf16, #tpu.memory_space<vmem>>, vector<256x512xbf16>
    %22 = arith.extf %21 : vector<256x512xbf16> to vector<256x512xf32>
    %cst_10 = arith.constant dense<0.000000e+00> : vector<8x512xf32>
    %23 = tpu.matmul %20, %22, %cst_10 {dimension_numbers = #tpu.dot_dimension_numbers<[1], [0], [0], [1], [0, 0, 1, 1], [], []>} : vector<8x256xf32>, vector<256x512xf32>, vector<8x512xf32> -> vector<8x512xf32>
    %c0_11 = arith.constant 0 : index
    %c0_12 = arith.constant 0 : index
    %24 = vector.load %arg5[%c0_11, %c0_12] : memref<1x512xf32, #tpu.memory_space<vmem>>, vector<1x512xf32>
    %25 = vector.broadcast %24 : vector<1x512xf32> to vector<8x512xf32>
    %26 = arith.addf %23, %25 : vector<8x512xf32>
    %cst_13 = arith.constant 0.000000e+00 : f32
    %27 = vector.broadcast %cst_13 : f32 to vector<8x512xf32>
    %28 = arith.maximumf %26, %27 : vector<8x512xf32>
    %c0_14 = arith.constant 0 : index
    %c0_15 = arith.constant 0 : index
    %29 = vector.load %arg6[%c0_14, %c0_15] : memref<512x128xbf16, #tpu.memory_space<vmem>>, vector<512x128xbf16>
    %30 = arith.extf %29 : vector<512x128xbf16> to vector<512x128xf32>
    %cst_16 = arith.constant dense<0.000000e+00> : vector<8x128xf32>
    %31 = tpu.matmul %28, %30, %cst_16 {dimension_numbers = #tpu.dot_dimension_numbers<[1], [0], [0], [1], [0, 0, 1, 1], [], []>} : vector<8x512xf32>, vector<512x128xf32>, vector<8x128xf32> -> vector<8x128xf32>
    %c0_17 = arith.constant 0 : index
    %c0_18 = arith.constant 0 : index
    %32 = vector.load %arg7[%c0_17, %c0_18] : memref<1x128xf32, #tpu.memory_space<vmem>>, vector<1x128xf32>
    %33 = vector.broadcast %32 : vector<1x128xf32> to vector<8x128xf32>
    %34 = arith.addf %31, %33 : vector<8x128xf32>
    %c0_19 = arith.constant 0 : index
    %c0_20 = arith.constant 0 : index
    %35 = vector.load %arg8[%c0_19, %c0_20] : memref<8x128xf32, #tpu.memory_space<vmem>>, vector<8x128xf32>
    tpu.vector_store %arg8[%c0_19, %c0_20], %34 {strides = array<i32>} : memref<8x128xf32, #tpu.memory_space<vmem>>, vector<8x128xf32>,
    return
  }
  func.func @transform_0(%arg0: i32) -> (i32, i32, i32) {
    %c0_i32 = arith.constant 0 : i32
    %c0_i32_0 = arith.constant 0 : i32
    %c0_i32_1 = arith.constant 0 : i32
    return %arg0, %c0_i32, %c0_i32_0 : i32, i32, i32
  }
  func.func @transform_1(%arg0: i32) -> (i32, i32) {
    %c0_i32 = arith.constant 0 : i32
    %c0_i32_0 = arith.constant 0 : i32
    %c0_i32_1 = arith.constant 0 : i32
    return %c0_i32, %c0_i32_0 : i32, i32
  }
  func.func @transform_2(%arg0: i32) -> i32 {
    %c0_i32 = arith.constant 0 : i32
    %c0_i32_0 = arith.constant 0 : i32
    return %c0_i32 : i32
  }
  func.func @transform_3(%arg0: i32) -> (i32, i32) {
    %c0_i32 = arith.constant 0 : i32
    %c0_i32_0 = arith.constant 0 : i32
    %c0_i32_1 = arith.constant 0 : i32
    return %c0_i32, %c0_i32_0 : i32, i32
  }
  func.func @transform_4(%arg0: i32) -> (i32, i32) {
    %c0_i32 = arith.constant 0 : i32
    %c0_i32_0 = arith.constant 0 : i32
    %c0_i32_1 = arith.constant 0 : i32
    return %c0_i32, %c0_i32_0 : i32, i32
  }
  func.func @transform_5(%arg0: i32) -> (i32, i32) {
    %c0_i32 = arith.constant 0 : i32
    %c0_i32_0 = arith.constant 0 : i32
    %c0_i32_1 = arith.constant 0 : i32
    return %c0_i32, %c0_i32_0 : i32, i32
  }
  func.func @transform_6(%arg0: i32) -> (i32, i32) {
    %c0_i32 = arith.constant 0 : i32
    %c0_i32_0 = arith.constant 0 : i32
    %c0_i32_1 = arith.constant 0 : i32
    return %c0_i32, %c0_i32_0 : i32, i32
  }
  func.func @transform_7(%arg0: i32) -> (i32, i32) {
    %c0_i32 = arith.constant 0 : i32
    %c0_i32_0 = arith.constant 0 : i32
    return %arg0, %c0_i32 : i32, i32
  }
}

</mosaic_0001>

<bundles_post_ra>
// kernel: improved_color_classifier_head.1
= control target key start
LH: loop header
LB: loop body
LE: loop exit
PB: predicated region body
PF: predicated region fallthrough
CT: control target
= control target key end

     0   :  { %s3311_s26 = smov 0   ;;  %s4923_s0 = inlined_call_operand.vmem [shape: bf16[16,64,256], index: 0, kind: input, shape index: {}]   ;;  %s4924_s1 = inlined_call_operand.vmem [shape: f32[1,256], index: 1, kind: input, shape index: {}]   ;;  %s4925_s2 = inlined_call_operand.<no memory space> [shape: f32[1], index: 2, kind: input, shape index: {}]   ;;  %s4926_s3 = inlined_call_operand.vmem [shape: bf16[256,512], index: 3, kind: input, shape index: {}]   ;;  %s4927_s4 = inlined_call_operand.vmem [shape: f32[1,512], index: 4, kind: input, shape index: {}]   ;;  %s4928_s5 = inlined_call_operand.vmem [shape: bf16[512,128], index: 5, kind: input, shape index: {}]   ;;  %s4929_s6 = inlined_call_operand.vmem [shape: f32[1,128], index: 6, kind: input, shape index: {}]   ;;  %s4930_s7 = inlined_call_operand.vmem [shape: f32[16,128], index: 7, kind: output, shape index: {}]  }
   0x1   :  { %12 = sst [smem:[#allocation2]] %s4925_s2 }
   0x2 LB: > { %s3317_s27 = sadd.s32 4294967295, %s3266_s26   ;;  %p2342_p0 = scmp.ge.s32.totalorder %s3266_s26, 1  ;;  %s3266_s26 = sphi %s3311_s26, %s18_s26  }
   0x3   : > { %p240_p1 = scmp.lt.s32.totalorder %s3266_s26, 3 }
   0x5   : > { %p241_p2 = pnand %p2342_p0, %p240_p1 }
   0x7   : > { %244 = sbr.rel (%p241_p2) target bundleno = 832 (0x340), region = 48 }
   0xe   : > { %s2343_s28 = sshll.u32 %s3317_s27, 3  ;;  %v477_v0 = vlaneseq  ;;  %v475_v1 = vld [vmem:[%s4924_s1] sm:$0x3]  ;;  %s807_s11 = sld [smem:[#allocation2]]  ;;  %vm1840_vm0 = vcmask 1041409   ;;  %vm1842_vm1 = vcmask 1042434  }
   0xf   : > { %p273_p3 = scmp.lt.s32.totalorder %s2343_s28, 15  ;;  %vm1844_vm2 = vcmask 1043459   ;;  %vm1846_vm3 = vcmask 1044484   ;;  %vm1848_vm4 = vcmask 1045509   ;;  %vm1850_vm5 = vcmask 1046534   ;;  %p279_p4 = scmp.lt.s32.totalorder %s3317_s27, 1 }
  0x10   : > { %v3325_v2 = vshrl.u32 %v477_v0, 7  ;;  %vm1852_vm6 = vcmask 1047559  }
  0x11   : > { %s5300_s28 = smov (!%p273_p3, %s2343_s28), 15  ;;  %s5302_s27 = smov (!%p279_p4, %s3317_s27), 1 }
  0x12   : > { %5097 = vst [vmem:[#allocation3_spill] sm:$0xff] %v3325_v2  ;;  %v4932_v3 = vsub.s32 0, %v3325_v2  ;;  %v4931_v4 = vsub.s32 1, %v3325_v2  ;;  %s2414_s30 = sshll.u32 %s5300_s28, 6 }
  0x13   : > { %s3332_s10 = scalar_lea.vmem %s4923_s0, %s2414_s30 }
  0x14   : > { %v3336_v5 = vrot.slane %v475_v1, %v4932_v3  ;;  %v3340_v6 = vrot.slane %v475_v1, %v4931_v4  ;;  %v3343_v7 = vld [vmem:[%s3332_s10 + $0x40] sm:$0xff]  ;;  %v3349_v9 = vld [vmem:[%s3332_s10 + $0x48] sm:$0xff]  ;;  %v3393_v29 = vld [vmem:[%s3332_s10 + $0x50] sm:$0xff] }
  0x15   : > { %v3346_v8 = vld [vmem:[%s3332_s10] sm:$0xff]  ;;  %v5010_v10 = vunpack.c.l.bf16 %v3343_v7  ;;  %v5003_v11 = vunpack.c.h.bf16 %v3343_v7  ;;  %v3356_v14 = vld [vmem:[%s3332_s10 + $0x8] sm:$0xff]  ;;  %v4996_v15 = vunpack.c.l.bf16 %v3349_v9  ;;  %v4993_v16 = vunpack.c.h.bf16 %v3349_v9  ;;  %v3398_v34 = vld [vmem:[%s3332_s10 + $0x10] sm:$0xff] }
  0x16   : > { %v5002_v12 = vunpack.c.l.bf16 %v3346_v8  ;;  %v4997_v13 = vunpack.c.h.bf16 %v3346_v8  ;;  %v4992_v17 = vunpack.c.l.bf16 %v3356_v14  ;;  %v4990_v18 = vunpack.c.h.bf16 %v3356_v14  ;;  %v3363_v19 = vld [vmem:[%s3332_s10 + $0x88] sm:$0xff]  ;;  %v3378_v24 = vld [vmem:[%s3332_s10 + $0x80] sm:$0xff]  ;;  %v3444_v60 = vld [vmem:[%s3332_s10 + $0x90] sm:$0xff] }
  0x17   : > { %v503_v20 = vmul.f32 %v3336_v5, %v5010_v10  ;;  %v504_v21 = vmul.f32 %v3340_v6, %v5003_v11  ;;  %v505_v25 = vmul.f32 %v3336_v5, %v4996_v15  ;;  %v506_v26 = vmul.f32 %v3340_v6, %v4993_v16  ;;  %v3403_v39 = vld [vmem:[%s3332_s10 + $0xc8] sm:$0xff]  ;;  %v3422_v48 = vld [vmem:[%s3332_s10 + $0xc0] sm:$0xff]  ;;  %v3736_v15 = vld [vmem:[%s3332_s10 + $0x30] sm:$0xff] }
  0x18   : > { %v487_v22 = vmul.f32 %v3336_v5, %v5002_v12  ;;  %v488_v23 = vmul.f32 %v3340_v6, %v4997_v13  ;;  %v489_v27 = vmul.f32 %v3336_v5, %v4992_v17  ;;  %v490_v28 = vmul.f32 %v3340_v6, %v4990_v18  ;;  %v3441_v59 = vld [vmem:[%s3332_s10 + $0x100] sm:$0xff]  ;;  %v3730_v16 = vld [vmem:[%s3332_s10 + $0xa8] sm:$0xff]  ;;  %5098 = vst [vmem:[#allocation4_spill] sm:$0xff] %v3736_v15  ;;  %v3793_v10 = vld [vmem:[%s3332_s10 + $0x1d8] sm:$0xff] }
  0x19   : > { %v639_v30 = vadd.f32 %v504_v21, %v503_v20  ;;  %v4986_v32 = vunpack.c.l.bf16 %v3363_v19  ;;  %v4983_v33 = vunpack.c.h.bf16 %v3363_v19  ;;  %v642_v35 = vadd.f32 %v506_v26, %v505_v25  ;;  %v3727_v17 = vld [vmem:[%s3332_s10 + $0x120] sm:$0xff]  ;;  %5102 = vst [vmem:[#allocation8_spill] sm:$0xff] %v3793_v10 }
  0x1a   : > { %v615_v31 = vadd.f32 %v488_v23, %v487_v22  ;;  %v618_v36 = vadd.f32 %v490_v28, %v489_v27  ;;  %v4982_v37 = vunpack.c.l.bf16 %v3378_v24  ;;  %v4974_v38 = vunpack.c.h.bf16 %v3378_v24  ;;  %v3454_v22 = vld [vmem:[%s3332_s10 + $0x18] sm:$0xff]  ;;  %v3466_v27 = vld [vmem:[%s3332_s10 + $0x108] sm:$0xff] }
  0x1b   : > { %640 = vadd.xlane.f32.xlu1 %v639_v30  ;;  %v521_v40 = vmul.f32 %v3336_v5, %v4986_v32  ;;  %v522_v41 = vmul.f32 %v3340_v6, %v4983_v33  ;;  %v4972_v42 = vunpack.c.l.bf16 %v3393_v29  ;;  %v4971_v43 = vunpack.c.h.bf16 %v3393_v29  ;;  %v3699_v33 = vld [vmem:[%s3332_s10 + $0x1d0] sm:$0xff] }
  0x1c   : > { %616 = vadd.xlane.f32.xlu0 %v615_v31  ;;  %v519_v44 = vmul.f32 %v3336_v5, %v4982_v37  ;;  %v520_v45 = vmul.f32 %v3340_v6, %v4974_v38  ;;  %v4970_v46 = vunpack.c.l.bf16 %v3398_v34  ;;  %v4964_v47 = vunpack.c.h.bf16 %v3398_v34  ;;  %v3661_v38 = vld [vmem:[%s3332_s10 + $0x28] sm:$0xff] }
  0x1d   : > { %v507_v49 = vmul.f32 %v3336_v5, %v4972_v42  ;;  %v508_v50 = vmul.f32 %v3340_v6, %v4971_v43  ;;  %v4962_v51 = vunpack.c.l.bf16 %v3403_v39  ;;  %v666_v52 = vadd.f32 %v522_v41, %v521_v40 }
  0x1e   : > { %v491_v53 = vmul.f32 %v3336_v5, %v4970_v46  ;;  %v492_v54 = vmul.f32 %v3340_v6, %v4964_v47  ;;  %v663_v55 = vadd.f32 %v520_v45, %v519_v44  ;;  %v4955_v56 = vunpack.c.h.bf16 %v3403_v39 }
  0x1f   : > { %643 = vadd.xlane.f32.xlu1 %v642_v35  ;;  %v4950_v57 = vunpack.c.l.bf16 %v3422_v48  ;;  %v4947_v58 = vunpack.c.h.bf16 %v3422_v48  ;;  %v645_v61 = vadd.f32 %v508_v50, %v507_v49  ;;  %v537_v63 = vmul.f32 %v3336_v5, %v4962_v51  ;;  %v3485_v50 = vld [vmem:[%s3332_s10 + $0xd0] sm:$0xff]  ;;  %v3617_v51 = vld [vmem:[%s3332_s10 + $0x1c8] sm:$0xff] }
  0x20   : > { %619 = vadd.xlane.f32.xlu0 %v618_v36  ;;  %v621_v62 = vadd.f32 %v492_v54, %v491_v53  ;;  %v4946_v0 = vunpack.c.l.bf16 %v3441_v59  ;;  %v4945_v1 = vunpack.c.h.bf16 %v3441_v59  ;;  %v4944_v20 = vunpack.c.l.bf16 %v3444_v60  ;;  %v3491_v53 = vld [vmem:[%s3332_s10 + $0x148] sm:$0xff] }
  0x21   : > { %v4941_v21 = vunpack.c.h.bf16 %v3444_v60  ;;  %v538_v23 = vmul.f32 %v3340_v6, %v4955_v56  ;;  %v535_v25 = vmul.f32 %v3336_v5, %v4950_v57  ;;  %v536_v26 = vmul.f32 %v3340_v6, %v4947_v58  ;;  %v3560_v58 = vld [vmem:[%s3332_s10 + $0x20] sm:$0xff] }
  0x22   : > { %v4936_v28 = vunpack.c.l.bf16 %v3454_v22  ;;  %v4935_v30 = vunpack.c.h.bf16 %v3454_v22  ;;  %v551_v31 = vmul.f32 %v3336_v5, %v4946_v0  ;;  %v552_v35 = vmul.f32 %v3340_v6, %v4945_v1  ;;  %v3557_v0 = vld [vmem:[%s3332_s10 + $0x60] sm:$0xff] }
  0x23   : > { %667 = vadd.xlane.f32.xlu1 %v666_v52  ;;  %v523_v36 = vmul.f32 %v3336_v5, %v4944_v20  ;;  %v524_v40 = vmul.f32 %v3340_v6, %v4941_v21  ;;  %v690_v41 = vadd.f32 %v538_v23, %v537_v63  ;;  %v687_v44 = vadd.f32 %v536_v26, %v535_v25  ;;  %v3488_v52 = vld [vmem:[%s3332_s10 + $0x58] sm:$0xff]  ;;  %v3552_v21 = vld [vmem:[%s3332_s10 + $0x180] sm:$0xff] }
  0x24   : > { %664 = vadd.xlane.f32.xlu0 %v663_v55  ;;  %v4934_v45 = vunpack.c.l.bf16 %v3466_v27  ;;  %v4933_v49 = vunpack.c.h.bf16 %v3466_v27  ;;  %v493_v54 = vmul.f32 %v3336_v5, %v4936_v28  ;;  %v494_v55 = vmul.f32 %v3340_v6, %v4935_v30  ;;  %v3526_v28 = vld [vmem:[%s3332_s10 + $0x98] sm:$0xff] }
  0x25   : > { %v669_v63 = vadd.f32 %v524_v40, %v523_v36  ;;  %v4937_v23 = vunpack.c.l.bf16 %v3485_v50  ;;  %v4938_v25 = vunpack.c.h.bf16 %v3485_v50  ;;  %v4940_v3 = vunpack.c.l.bf16 %v3488_v52 }
  0x26   : > { %v553_v26 = vmul.f32 %v3336_v5, %v4934_v45  ;;  %v554_v4 = vmul.f32 %v3340_v6, %v4933_v49  ;;  %v624_v36 = vadd.f32 %v494_v55, %v493_v54  ;;  %v4942_v40 = vunpack.c.l.bf16 %v3491_v53 }
  0x27   : > { %646 = vadd.xlane.f32.xlu1 %v645_v61  ;;  %v3500_v61 = vld [vmem:[%s3332_s10 + $0x140] sm:$0xff]  ;;  %v540_v49 = vmul.f32 %v3340_v6, %v4938_v25  ;;  %v509_v55 = vmul.f32 %v3336_v5, %v4940_v3  ;;  %v4951_v20 = vunpack.c.l.bf16 %v3526_v28  ;;  %v4952_v1 = vunpack.c.h.bf16 %v3526_v28 }
  0x28   : > { %622 = vadd.xlane.f32.xlu0 %v621_v62  ;;  %v711_v62 = vadd.f32 %v552_v35, %v551_v31  ;;  %v4939_v31 = vunpack.c.h.bf16 %v3488_v52  ;;  %v3513_v35 = vld [vmem:[%s3332_s10 + $0x110] sm:$0xff]  ;;  %v4948_v45 = vunpack.c.l.bf16 %v3500_v61  ;;  %v4949_v30 = vunpack.c.h.bf16 %v3500_v61 }
  0x29   : > { %v714_v54 = vadd.f32 %v554_v4, %v553_v26  ;;  %v569_v25 = vmul.f32 %v3336_v5, %v4942_v40  ;;  %v4954_v4 = vunpack.c.l.bf16 %v3513_v35  ;;  %v4953_v3 = vunpack.c.h.bf16 %v3513_v35 }
  0x2a   : > { %v567_v26 = vmul.f32 %v3336_v5, %v4948_v45 }
  0x2b   : > { %691 = vadd.xlane.f32.xlu1 %v690_v41  ;;  %v4943_v41 = vunpack.c.h.bf16 %v3491_v53 }
  0x2c   : > { %688 = vadd.xlane.f32.xlu0 %v687_v44  ;;  %v539_v44 = vmul.f32 %v3336_v5, %v4937_v23  ;;  %v510_v23 = vmul.f32 %v3340_v6, %v4939_v31  ;;  %v568_v31 = vmul.f32 %v3340_v6, %v4949_v30  ;;  %v555_v30 = vmul.f32 %v3336_v5, %v4954_v4 }
  0x2e   : > { %v693_v40 = vadd.f32 %v540_v49, %v539_v44  ;;  %v735_v57 = vadd.f32 %v568_v31, %v567_v26  ;;  %v526_v44 = vmul.f32 %v3340_v6, %v4952_v1  ;;  %v4959_v31 = vunpack.c.l.bf16 %v3552_v21 }
  0x2f   : > { %712 = vadd.xlane.f32.xlu1 %v711_v62  ;;  %v570_v62 = vmul.f32 %v3340_v6, %v4943_v41  ;;  %v648_v41 = vadd.f32 %v510_v23, %v509_v55  ;;  %v4958_v55 = vunpack.c.l.bf16 %v3557_v0 }
  0x30   : > { %670 = vadd.xlane.f32.xlu0 %v669_v63  ;;  %v3542_v63 = vld [vmem:[%s3332_s10 + $0x188] sm:$0xff]  ;;  %v583_v56 = vmul.f32 %v3336_v5, %v4959_v31 }
  0x31   : > { %v738_v45 = vadd.f32 %v570_v62, %v569_v25  ;;  %v4960_v49 = vunpack.c.l.bf16 %v3542_v63  ;;  %v4956_v23 = vunpack.c.h.bf16 %v3542_v63  ;;  %v525_v25 = vmul.f32 %v3336_v5, %v4951_v20 }
  0x32   : > { %v4961_v62 = vunpack.c.h.bf16 %v3557_v0 }
  0x33   : > { %625 = vadd.xlane.f32.xlu1 %v624_v36  ;;  %v556_v36 = vmul.f32 %v3340_v6, %v4953_v3  ;;  %v585_v20 = vmul.f32 %v3336_v5, %v4960_v49  ;;  %v586_v1 = vmul.f32 %v3340_v6, %v4956_v23  ;;  %v3589_v3 = vld [vmem:[%s3332_s10 + $0x150] sm:$0xff]  ;;  %v672_v4 = vadd.f32 %v526_v44, %v525_v25  ;;  %v3601_v23 = vld [vmem:[%s3332_s10 + $0xd8] sm:$0xff] }
  0x34   : > { %715 = vadd.xlane.f32.xlu0 %v714_v54  ;;  %v4957_v54 = vunpack.c.h.bf16 %v3552_v21  ;;  %v4966_v44 = vunpack.c.l.bf16 %v3589_v3  ;;  %v4967_v31 = vunpack.c.h.bf16 %v3589_v3  ;;  %v4968_v49 = vunpack.c.l.bf16 %v3601_v23 }
  0x35   : > { %v717_v26 = vadd.f32 %v556_v36, %v555_v30  ;;  %v511_v36 = vmul.f32 %v3336_v5, %v4958_v55 }
  0x36   : > { %v584_v30 = vmul.f32 %v3340_v6, %v4957_v54  ;;  %v762_v54 = vadd.f32 %v586_v1, %v585_v20  ;;  %v571_v1 = vmul.f32 %v3336_v5, %v4966_v44  ;;  %v4973_v20 = vunpack.c.l.bf16 %v3617_v51 }
  0x37   : > { %694 = vadd.xlane.f32.xlu1 %v693_v40  ;;  %v4963_v40 = vunpack.c.l.bf16 %v3560_v58 }
  0x38   : > { %649 = vadd.xlane.f32.xlu0 %v648_v41  ;;  %v4965_v41 = vunpack.c.h.bf16 %v3560_v58  ;;  %v759_v55 = vadd.f32 %v584_v30, %v583_v56  ;;  %v4975_v56 = vunpack.c.h.bf16 %v3617_v51  ;;  %v3630_v30 = vld [vmem:[%s3332_s10 + $0x118] sm:$0xff] }
  0x39   : > { %v4978_v44 = vunpack.c.l.bf16 %v3630_v30 }
  0x3a   : > { %v496_v25 = vmul.f32 %v3340_v6, %v4965_v41 }
  0x3b   : > { %739 = vadd.xlane.f32.xlu1 %v738_v45  ;;  %v495_v45 = vmul.f32 %v3336_v5, %v4963_v40  ;;  %v3620_v40 = vld [vmem:[%s3332_s10 + $0x1c0] sm:$0xff] }
  0x3c   : > { %736 = vadd.xlane.f32.xlu0 %v735_v57  ;;  %v512_v57 = vmul.f32 %v3340_v6, %v4961_v62  ;;  %v4969_v62 = vunpack.c.h.bf16 %v3601_v23 }
  0x3d   : > { %v627_v41 = vadd.f32 %v496_v25, %v495_v45  ;;  %v3642_v25 = vld [vmem:[%s3332_s10 + $0xa0] sm:$0xff] }
  0x3e   : > { %v651_v47 = vadd.f32 %v512_v57, %v511_v36  ;;  %v572_v36 = vmul.f32 %v3340_v6, %v4967_v31  ;;  %v541_v57 = vmul.f32 %v3336_v5, %v4968_v49  ;;  %v542_v45 = vmul.f32 %v3340_v6, %v4969_v62 }
  0x3f   : > { %718 = vadd.xlane.f32.xlu1 %v717_v26  ;;  %v4977_v26 = vunpack.c.h.bf16 %v3620_v40  ;;  %v602_v31 = vmul.f32 %v3340_v6, %v4975_v56  ;;  %v4981_v42 = vunpack.c.l.bf16 %v3642_v25  ;;  %v3664_v56 = vld [vmem:[%s3332_s10 + $0x190] sm:$0xff] }
  0x40   : > { %673 = vadd.xlane.f32.xlu0 %v672_v4  ;;  %v4976_v4 = vunpack.c.l.bf16 %v3620_v40  ;;  %v741_v46 = vadd.f32 %v572_v36, %v571_v1  ;;  %v696_v43 = vadd.f32 %v542_v45, %v541_v57  ;;  %v4984_v36 = vunpack.c.l.bf16 %v3661_v38  ;;  %v3675_v45 = vld [vmem:[%s3332_s10 + $0xe0] sm:$0xff] }
  0x41   : > { %v600_v62 = vmul.f32 %v3340_v6, %v4977_v26  ;;  %v4985_v57 = vunpack.c.h.bf16 %v3661_v38  ;;  %v527_v26 = vmul.f32 %v3336_v5, %v4981_v42 }
  0x42   : > { %v599_v49 = vmul.f32 %v3336_v5, %v4976_v4  ;;  %v557_v4 = vmul.f32 %v3336_v5, %v4978_v44 }
  0x43   : > { %763 = vadd.xlane.f32.xlu1 %v762_v54  ;;  %v4979_v54 = vunpack.c.h.bf16 %v3630_v30 }
  0x44   : > { %760 = vadd.xlane.f32.xlu0 %v759_v55  ;;  %v601_v55 = vmul.f32 %v3336_v5, %v4973_v20  ;;  %v4980_v20 = vunpack.c.h.bf16 %v3642_v25  ;;  %v783_v1 = vadd.f32 %v600_v62, %v599_v49  ;;  %v4987_v49 = vunpack.c.h.bf16 %v3664_v56  ;;  %v3686_v62 = vld [vmem:[%s3332_s10 + $0x68] sm:$0xff] }
  0x45   : > { %v4994_v42 = vunpack.c.l.bf16 %v3686_v62  ;;  %v4995_v37 = vunpack.c.h.bf16 %v3686_v62 }
  0x46   : > { %v528_v44 = vmul.f32 %v3340_v6, %v4980_v20  ;;  %v498_v20 = vmul.f32 %v3340_v6, %v4985_v57  ;;  %v3708_v57 = vld [vmem:[%s3332_s10 + $0x158] sm:$0xff] }
  0x47   : > { %652 = vadd.xlane.f32.xlu1 %v651_v47  ;;  %v558_v47 = vmul.f32 %v3340_v6, %v4979_v54  ;;  %v4988_v54 = vunpack.c.l.bf16 %v3675_v45  ;;  %v4999_v18 = vunpack.c.l.bf16 %v3708_v57 }
  0x48   : > { %628 = vadd.xlane.f32.xlu0 %v627_v41  ;;  %v786_v41 = vadd.f32 %v602_v31, %v601_v55  ;;  %v4989_v31 = vunpack.c.l.bf16 %v3664_v56 }
  0x49   : > { %v720_v55 = vadd.f32 %v558_v47, %v557_v4  ;;  %v675_v4 = vadd.f32 %v528_v44, %v527_v26  ;;  %v543_v32 = vmul.f32 %v3336_v5, %v4988_v54  ;;  %v5001_v26 = vunpack.c.l.bf16 %v3699_v33 }
  0x4a   : > { %v587_v47 = vmul.f32 %v3336_v5, %v4989_v31 }
  0x4b   : > { %742 = vadd.xlane.f32.xlu1 %v741_v46  ;;  %v497_v46 = vmul.f32 %v3336_v5, %v4984_v36  ;;  %v588_v36 = vmul.f32 %v3340_v6, %v4987_v49  ;;  %v4998_v49 = vunpack.c.h.bf16 %v3699_v33 }
  0x4c   : > { %697 = vadd.xlane.f32.xlu0 %v696_v43  ;;  %v4991_v43 = vunpack.c.h.bf16 %v3675_v45 }
  0x4d   : > { %v630_v54 = vadd.f32 %v498_v20, %v497_v46  ;;  %v765_v31 = vadd.f32 %v588_v36, %v587_v47  ;;  %v604_v20 = vmul.f32 %v3340_v6, %v4998_v49  ;;  %v5008_v36 = vunpack.c.l.bf16 %v3727_v17  ;;  %v3744_v46 = vld [vmem:[%s3332_s10 + $0x198] sm:$0xff] }
  0x4e   : > { %v544_v44 = vmul.f32 %v3340_v6, %v4991_v43  ;;  %v5000_v43 = vunpack.c.h.bf16 %v3708_v57  ;;  %5099 = vst [vmem:[#allocation5_spill] sm:$0xff] %v3744_v46  ;;  %v5007_v47 = vunpack.c.l.bf16 %v3730_v16 }
  0x4f   : > { %787 = vadd.xlane.f32.xlu1 %v786_v41  ;;  %v513_v41 = vmul.f32 %v3336_v5, %v4994_v42 }
  0x50   : > { %784 = vadd.xlane.f32.xlu0 %v783_v1  ;;  %v514_v1 = vmul.f32 %v3340_v6, %v4995_v37  ;;  %v699_v42 = vadd.f32 %v544_v44, %v543_v32  ;;  %v603_v37 = vmul.f32 %v3336_v5, %v5001_v26  ;;  %v573_v32 = vmul.f32 %v3336_v5, %v4999_v18  ;;  %v3765_v26 = vld [vmem:[%s3332_s10 + $0xe8] sm:$0xff] }
  0x51   : > { %v5005_v44 = vunpack.c.h.bf16 %v3730_v16  ;;  %v559_v18 = vmul.f32 %v3336_v5, %v5008_v36  ;;  %5100 = vst [vmem:[#allocation6_spill] sm:$0xff] %v3765_v26  ;;  %v529_v11 = vmul.f32 %v3336_v5, %v5007_v47  ;;  %v5016_v47 = vunpack.c.h.bf16 %v3765_v26 }
  0x52   : > { %v654_v13 = vadd.f32 %v514_v1, %v513_v41  ;;  %v5006_v41 = vunpack.c.l.bf16 %v3736_v15  ;;  %v5009_v1 = vunpack.c.h.bf16 %v3736_v15  ;;  %v789_v49 = vadd.f32 %v604_v20, %v603_v37 }
  0x53   : > { %721 = vadd.xlane.f32.xlu1 %v720_v55  ;;  %v5004_v55 = vunpack.c.h.bf16 %v3727_v17  ;;  %v530_v37 = vmul.f32 %v3340_v6, %v5005_v44 }
  0x54   : > { %676 = vadd.xlane.f32.xlu0 %v675_v4  ;;  %v574_v4 = vmul.f32 %v3340_v6, %v5000_v43  ;;  %v499_v20 = vmul.f32 %v3336_v5, %v5006_v41 }
  0x55   : > { %v560_v43 = vmul.f32 %v3340_v6, %v5004_v55  ;;  %v3777_v55 = vld [vmem:[%s3332_s10 + $0x70] sm:$0xff]  ;;  %v678_v41 = vadd.f32 %v530_v37, %v529_v11  ;;  %v5022_v11 = vunpack.c.h.bf16 %v3793_v10  ;;  %v3806_v37 = vld [vmem:[%s3332_s10 + $0x128] sm:$0xff] }
  0x56   : > { %v744_v12 = vadd.f32 %v574_v4, %v573_v32  ;;  %5101 = vst [vmem:[#allocation7_spill] sm:$0xff] %v3777_v55  ;;  %v5015_v4 = vunpack.c.l.bf16 %v3765_v26  ;;  %v5017_v36 = vunpack.c.l.bf16 %v3777_v55  ;;  %5104 = vst [vmem:[#allocation10_spill] sm:$0xff] %v3806_v37 }
  0x57   : > { %631 = vadd.xlane.f32.xlu1 %v630_v54  ;;  %v5011_v54 = vunpack.c.l.bf16 %v3744_v46  ;;  %v723_v44 = vadd.f32 %v560_v43, %v559_v18 }
  0x58   : > { %766 = vadd.xlane.f32.xlu0 %v765_v31  ;;  %v5014_v31 = vunpack.c.h.bf16 %v3744_v46  ;;  %v545_v18 = vmul.f32 %v3336_v5, %v5015_v4 }
  0x5a   : > { %v590_v32 = vmul.f32 %v3340_v6, %v5014_v31 }
  0x5b   : > { %700 = vadd.xlane.f32.xlu1 %v699_v42  ;;  %v589_v42 = vmul.f32 %v3336_v5, %v5011_v54  ;;  %v3796_v54 = vld [vmem:[%s3332_s10 + $0x160] sm:$0xff] }
  0x5c   : > { %655 = vadd.xlane.f32.xlu0 %v654_v13  ;;  %v500_v13 = vmul.f32 %v3340_v6, %v5009_v1  ;;  %v5018_v1 = vunpack.c.h.bf16 %v3777_v55  ;;  %5103 = vst [vmem:[#allocation9_spill] sm:$0xff] %v3796_v54  ;;  %v5028_v43 = vunpack.c.h.bf16 %v3796_v54  ;;  %v3835_v55 = vld [vmem:[%s3332_s10 + $0x38] sm:$0xff] }
  0x5d   : > { %v768_v31 = vadd.f32 %v590_v32, %v589_v42  ;;  %v3818_v32 = vld [vmem:[%s3332_s10 + $0xb0] sm:$0xff]  ;;  %5106 = vst [vmem:[#allocation12_spill] sm:$0xff] %v3835_v55 }
  0x5e   : > { %v633_v2 = vadd.f32 %v500_v13, %v499_v20  ;;  %v546_v20 = vmul.f32 %v3340_v6, %v5016_v47  ;;  %v515_v13 = vmul.f32 %v3336_v5, %v5017_v36  ;;  %v516_v42 = vmul.f32 %v3340_v6, %v5018_v1  ;;  %5105 = vst [vmem:[#allocation11_spill] sm:$0xff] %v3818_v32 }
  0x5f   : > { %790 = vadd.xlane.f32.xlu1 %v789_v49  ;;  %v5025_v49 = vunpack.c.l.bf16 %v3796_v54  ;;  %v606_v47 = vmul.f32 %v3340_v6, %v5022_v11  ;;  %v576_v1 = vmul.f32 %v3340_v6, %v5028_v43  ;;  %v5031_v11 = vunpack.c.h.bf16 %v3818_v32 }
  0x60   : > { %745 = vadd.xlane.f32.xlu0 %v744_v12  ;;  %v5021_v12 = vunpack.c.l.bf16 %v3793_v10  ;;  %v657_v4 = vadd.f32 %v516_v42, %v515_v13  ;;  %v3840_v10 = vld [vmem:[%s3332_s10 + $0x1a0] sm:$0xff]  ;;  %v5109_v43 = vunpack.c.h.bf16 %v3806_v37 }
  0x61   : > { %v575_v36 = vmul.f32 %v3336_v5, %v5025_v49  ;;  %5107 = vst [vmem:[#allocation13_spill] sm:$0xff] %v3840_v10  ;;  %v5108_v49 = vunpack.c.l.bf16 %v3806_v37  ;;  %v3875_v42 = vld [vmem:[%s3332_s10 + $0x1e0] sm:$0xff] }
  0x62   : > { %v562_v26 = vmul.f32 %v3340_v6, %v5109_v43  ;;  %5113 = vst [vmem:[#allocation16_spill] sm:$0xff] %v3875_v42 }
  0x63   : > { %724 = vadd.xlane.f32.xlu1 %v723_v44  ;;  %v702_v44 = vadd.f32 %v546_v20, %v545_v18  ;;  %v561_v54 = vmul.f32 %v3336_v5, %v5108_v49  ;;  %v747_v20 = vadd.f32 %v576_v1, %v575_v36  ;;  %v532_v49 = vmul.f32 %v3340_v6, %v5031_v11  ;;  %v3884_v11 = vld [vmem:[%s3332_s10 + $0x168] sm:$0xff] }
  0x64   : > { %679 = vadd.xlane.f32.xlu0 %v678_v41  ;;  %v605_v41 = vmul.f32 %v3336_v5, %v5021_v12  ;;  %v5032_v12 = vunpack.c.l.bf16 %v3818_v32  ;;  %v5112_v1 = vunpack.c.l.bf16 %v3835_v55  ;;  %5116 = vst [vmem:[#allocation17_spill] sm:$0xff] %v3884_v11  ;;  %v5047_v37 = vunpack.c.l.bf16 %v3884_v11 }
  0x65   : > { %v726_v36 = vadd.f32 %v562_v26, %v561_v54  ;;  %v5114_v54 = vunpack.c.l.bf16 %v3840_v10 }
  0x66   : > { %v792_v18 = vadd.f32 %v606_v47, %v605_v41  ;;  %v531_v13 = vmul.f32 %v3336_v5, %v5032_v12  ;;  %v3862_v47 = vld [vmem:[%s3332_s10 + $0x78] sm:$0xff] }
  0x67   : > { %634 = vadd.xlane.f32.xlu1 %v633_v2  ;;  %v3859_v2 = vld [vmem:[%s3332_s10 + $0xf0] sm:$0xff]  ;;  %5111 = vst [vmem:[#allocation15_spill] sm:$0xff] %v3862_v47 }
  0x68   : > { %769 = vadd.xlane.f32.xlu0 %v768_v31  ;;  %v5033_v31 = vunpack.c.h.bf16 %v3835_v55  ;;  %5110 = vst [vmem:[#allocation14_spill] sm:$0xff] %v3859_v2  ;;  %v681_v26 = vadd.f32 %v532_v49, %v531_v13  ;;  %v5118_v13 = vunpack.c.h.bf16 %v3859_v2  ;;  %v5124_v55 = vunpack.c.h.bf16 %v3875_v42 }
  0x6a   : > { %v548_v49 = vmul.f32 %v3340_v6, %v5118_v13  ;;  %v3906_v13 = vld [vmem:[%s3332_s10 + $0xb8] sm:$0xff] }
  0x6b   : > { %703 = vadd.xlane.f32.xlu1 %v702_v44  ;;  %v502_v44 = vmul.f32 %v3340_v6, %v5033_v31  ;;  %v5115_v31 = vunpack.c.h.bf16 %v3840_v10  ;;  %5122 = vst [vmem:[#allocation19_spill] sm:$0xff] %v3906_v13 }
  0x6c   : > { %658 = vadd.xlane.f32.xlu0 %v657_v4  ;;  %v501_v4 = vmul.f32 %v3336_v5, %v5112_v1  ;;  %v591_v1 = vmul.f32 %v3336_v5, %v5114_v54  ;;  %v5119_v54 = vunpack.c.l.bf16 %v3862_v47 }
  0x6d   : > { %v592_v41 = vmul.f32 %v3340_v6, %v5115_v31  ;;  %v5120_v31 = vunpack.c.h.bf16 %v3862_v47 }
  0x6e   : > { %v517_v10 = vmul.f32 %v3336_v5, %v5119_v54  ;;  %v636_v43 = vadd.f32 %v502_v44, %v501_v4  ;;  %v5123_v54 = vunpack.c.l.bf16 %v3875_v42  ;;  %v3966_v42 = vld [vmem:[%s3332_s10 + $0x1b0] sm:$0xff] }
  0x6f   : > { %793 = vadd.xlane.f32.xlu1 %v792_v18  ;;  %v5117_v18 = vunpack.c.l.bf16 %v3859_v2  ;;  %v518_v32 = vmul.f32 %v3340_v6, %v5120_v31  ;;  %v771_v12 = vadd.f32 %v592_v41, %v591_v1  ;;  %v3903_v2 = vld [vmem:[%s3332_s10 + $0x130] sm:$0xff]  ;;  %v3917_v1 = vld [vmem:[%s3332_s10 + $0xf8] sm:$0xff]  ;;  %v577_v31 = vmul.f32 %v3336_v5, %v5047_v37  ;;  %5134 = vst [vmem:[#allocation24_spill] sm:$0xff] %v3966_v42 }
  0x70   : > { %748 = vadd.xlane.f32.xlu0 %v747_v20  ;;  %5121 = vst [vmem:[#allocation18_spill] sm:$0xff] %v3903_v2  ;;  %v607_v47 = vmul.f32 %v3336_v5, %v5123_v54  ;;  %v5048_v44 = vunpack.c.l.bf16 %v3903_v2  ;;  %v5049_v41 = vunpack.c.h.bf16 %v3903_v2  ;;  %5125 = vst [vmem:[#allocation20_spill] sm:$0xff] %v3917_v1  ;;  %v5130_v37 = vunpack.c.l.bf16 %v3917_v1 }
  0x71   : > { %v547_v20 = vmul.f32 %v3336_v5, %v5117_v18  ;;  %v5046_v18 = vunpack.c.h.bf16 %v3884_v11  ;;  %v660_v4 = vadd.f32 %v518_v32, %v517_v10  ;;  %v3928_v32 = vld [vmem:[%s3332_s10 + $0x1a8] sm:$0xff]  ;;  %v5071_v2 = vunpack.c.h.bf16 %v3966_v42 }
  0x72   : > { %5126 = vst [vmem:[#allocation21_spill] sm:$0xff] %v3928_v32  ;;  %v549_v10 = vmul.f32 %v3336_v5, %v5130_v37 }
  0x73   : > { %727 = vadd.xlane.f32.xlu1 %v726_v36  ;;  %v608_v36 = vmul.f32 %v3340_v6, %v5124_v55  ;;  %v578_v54 = vmul.f32 %v3340_v6, %v5046_v18  ;;  %v5050_v55 = vunpack.c.l.bf16 %v3906_v13  ;;  %v564_v18 = vmul.f32 %v3340_v6, %v5049_v41  ;;  %v3950_v41 = vld [vmem:[%s3332_s10 + $0x170] sm:$0xff] }
  0x74   : > { %682 = vadd.xlane.f32.xlu0 %v681_v26  ;;  %v705_v26 = vadd.f32 %v548_v49, %v547_v20  ;;  %v563_v49 = vmul.f32 %v3336_v5, %v5048_v44  ;;  %5129 = vst [vmem:[#allocation23_spill] sm:$0xff] %v3950_v41 }
  0x75   : > { %v795_v20 = vadd.f32 %v608_v36, %v607_v47  ;;  %v750_v47 = vadd.f32 %v578_v54, %v577_v31  ;;  %v533_v36 = vmul.f32 %v3336_v5, %v5050_v55  ;;  %v5132_v54 = vunpack.c.l.bf16 %v3928_v32 }
  0x76   : > { %v729_v31 = vadd.f32 %v564_v18, %v563_v49  ;;  %v5063_v18 = vunpack.c.l.bf16 %v3950_v41  ;;  %v5064_v49 = vunpack.c.h.bf16 %v3950_v41 }
  0x77   : > { %637 = vadd.xlane.f32.xlu1 %v636_v43  ;;  %v3947_v43 = vld [vmem:[%s3332_s10 + $0x1e8] sm:$0xff]  ;;  %v593_v55 = vmul.f32 %v3336_v5, %v5132_v54 }
  0x78   : > { %772 = vadd.xlane.f32.xlu0 %v771_v12  ;;  %v5127_v12 = vunpack.c.h.bf16 %v3906_v13  ;;  %5128 = vst [vmem:[#allocation22_spill] sm:$0xff] %v3947_v43  ;;  %v5136_v13 = vunpack.c.l.bf16 %v3947_v43 }
  0x7a   : > { %v534_v44 = vmul.f32 %v3340_v6, %v5127_v12  ;;  %v5133_v12 = vunpack.c.h.bf16 %v3928_v32 }
  0x7b   : > { %706 = vadd.xlane.f32.xlu1 %v705_v26  ;;  %v5131_v26 = vunpack.c.h.bf16 %v3917_v1  ;;  %v5065_v1 = vunpack.c.h.bf16 %v3947_v43  ;;  %v4013_v43 = vld [vmem:[%s3332_s10 + $0x1f8] sm:$0xff] }
  0x7c   : > { %661 = vadd.xlane.f32.xlu0 %v660_v4  ;;  %v594_v11 = vmul.f32 %v3340_v6, %v5133_v12  ;;  %v684_v37 = vadd.f32 %v534_v44, %v533_v36  ;;  %v5068_v12 = vunpack.c.l.bf16 %v3966_v42  ;;  %v3982_v36 = vld [vmem:[%s3332_s10 + $0x1f0] sm:$0xff]  ;;  %5139 = vst [vmem:[#allocation28_spill] sm:$0xff] %v4013_v43 }
  0x7d   : > { %v550_v4 = vmul.f32 %v3340_v6, %v5131_v26  ;;  %v3972_v26 = vld [vmem:[%s3332_s10 + $0x138] sm:$0xff]  ;;  %5137 = vst [vmem:[#allocation26_spill] sm:$0xff] %v3982_v36 }
  0x7e   : > { %5135 = vst [vmem:[#allocation25_spill] sm:$0xff] %v3972_v26  ;;  %v774_v32 = vadd.f32 %v594_v11, %v593_v55  ;;  %v5076_v44 = vunpack.c.l.bf16 %v3972_v26  ;;  %v579_v11 = vmul.f32 %v3336_v5, %v5063_v18  ;;  %v3994_v55 = vld [vmem:[%s3332_s10 + $0x178] sm:$0xff] }
  0x7f   : > { %796 = vadd.xlane.f32.xlu1 %v795_v20  ;;  %v708_v54 = vadd.f32 %v550_v4, %v549_v10  ;;  %v609_v20 = vmul.f32 %v3336_v5, %v5136_v13  ;;  %v610_v10 = vmul.f32 %v3340_v6, %v5065_v1  ;;  %v580_v13 = vmul.f32 %v3340_v6, %v5064_v49 }
  0x80   : > { %751 = vadd.xlane.f32.xlu0 %v750_v47  ;;  %v5079_v47 = vunpack.c.h.bf16 %v3972_v26  ;;  %5138 = vst [vmem:[#allocation27_spill] sm:$0xff] %v3994_v55  ;;  %v595_v4 = vmul.f32 %v3336_v5, %v5068_v12  ;;  %v565_v18 = vmul.f32 %v3336_v5, %v5076_v44  ;;  %v5086_v1 = vunpack.c.h.bf16 %v3982_v36 }
  0x81   : > { %v798_v41 = vadd.f32 %v610_v10, %v609_v20  ;;  %v753_v12 = vadd.f32 %v580_v13, %v579_v11  ;;  %v5085_v42 = vunpack.c.l.bf16 %v3994_v55  ;;  %v5141_v44 = vunpack.c.l.bf16 %v3982_v36 }
  0x82   : > { %v566_v49 = vmul.f32 %v3340_v6, %v5079_v47  ;;  %v5083_v20 = vunpack.c.h.bf16 %v4013_v43 }
  0x83   : > { %730 = vadd.xlane.f32.xlu1 %v729_v31  ;;  %v596_v31 = vmul.f32 %v3340_v6, %v5071_v2  ;;  %v5084_v2 = vunpack.c.h.bf16 %v3994_v55  ;;  %v611_v26 = vmul.f32 %v3336_v5, %v5141_v44  ;;  %v581_v10 = vmul.f32 %v3336_v5, %v5085_v42  ;;  %v2944_v55 = vld [vmem:[%s4926_s3 + $0xc4] ss:$16 sps:$4 sm:$0xff]  }
  0x84   : > { %685 = vadd.xlane.f32.xlu0 %v684_v37  ;;  %v4016_v37 = vld [vmem:[%s3332_s10 + $0x1b8] sm:$0xff]  ;;  %v732_v47 = vadd.f32 %v566_v49, %v565_v18  ;;  %s2346_s10 = sshll.u32 %s5302_s27, 3 }
  0x85   : > { %5140 = vst [vmem:[#allocation29_spill] sm:$0xff] %v4016_v37  ;;  %v777_v46 = vadd.f32 %v596_v31, %v595_v4  ;;  %v582_v11 = vmul.f32 %v3340_v6, %v5084_v2  ;;  %v5081_v18 = vunpack.c.l.bf16 %v4016_v37  ;;  %v5080_v49 = vunpack.c.h.bf16 %v4016_v37  ;;  %s282_s13 = scalar_lea.vmem %s4930_s7, %s2346_s10 }
  0x87   : > { %709 = vadd.xlane.f32.xlu1 %v708_v54  ;;  %v5082_v54 = vunpack.c.l.bf16 %v4013_v43  ;;  %v597_v4 = vmul.f32 %v3336_v5, %v5081_v18  ;;  %v598_v31 = vmul.f32 %v3340_v6, %v5080_v49 }
  0x88   : > { %775 = vadd.xlane.f32.xlu0 %v774_v32  ;;  %v612_v32 = vmul.f32 %v3340_v6, %v5086_v1 }
  0x89   : > { %v613_v13 = vmul.f32 %v3336_v5, %v5082_v54  ;;  %v4052_v5 = vstv %s807_s11 }
  0x8a   : > { %v801_v44 = vadd.f32 %v612_v32, %v611_v26  ;;  %v780_v32 = vadd.f32 %v598_v31, %v597_v4 }
  0x8b   : > { %799 = vadd.xlane.f32.xlu1 %v798_v41  ;;  %v614_v41 = vmul.f32 %v3340_v6, %v5083_v20  ;;  %v2912_v6 = vld [vmem:[%s4926_s3] ss:$16 sps:$4 sm:$0xff]  }
  0x8c   : > { %754 = vadd.xlane.f32.xlu0 %v753_v12  ;;  %v756_v12 = vadd.f32 %v582_v11, %v581_v10  ;;  %v2913_v10 = vld [vmem:[%s4926_s3 + $0x8] ss:$16 sps:$4 sm:$0xff]  }
  0x8d   : > { %v804_v26 = vadd.f32 %v614_v41, %v613_v13 }
  0x8f   : > { %778 = vadd.xlane.f32.xlu1 %v777_v46  ;;  %v2908_v46 = vld [vmem:[%s4926_s3 + $0x4] ss:$16 sps:$4 sm:$0xff]  }
  0x90   : > { %733 = vadd.xlane.f32.xlu0 %v732_v47  ;;  %v2910_v47 = vld [vmem:[%s4926_s3 + $0xc] ss:$16 sps:$4 sm:$0xff]   ;;  %2645 = vmatprep.subr.bf16.mxu0 %v2908_v46 }
  0x91   : > { %2709 = vmatprep.subr.bf16.mxu1 %v2910_v47  ;;  %2647 = vmatpush1.bf16.msra.mxu0 %v2912_v6  ;;  %v2916_v46 = vld [vmem:[%s4926_s3 + $0x2c] ss:$16 sps:$4 sm:$0xff]  }
  0x92   : > { %2711 = vmatpush1.bf16.msra.mxu1 %v2913_v10  ;;  %v2918_v10 = vld [vmem:[%s4926_s3 + $0x20] ss:$16 sps:$4 sm:$0xff]  }
  0x93   : > { %802 = vadd.xlane.f32.xlu1 %v801_v44  ;;  %2713 = vmatprep.subr.bf16.mxu1 %v2916_v46  ;;  %v2925_v46 = vld [vmem:[%s4926_s3 + $0x48] ss:$16 sps:$4 sm:$0xff]  }
  0x94   : > { %757 = vadd.xlane.f32.xlu0 %v756_v12 }
  0x97   : > { %805 = vadd.xlane.f32.xlu1 %v804_v26 }
  0x98   : > { %781 = vadd.xlane.f32.xlu0 %v780_v32  ;;  %v2914_v32 = vld [vmem:[%s4926_s3 + $0x24] ss:$16 sps:$4 sm:$0xff]  }
  0x99   : > { %2649 = vmatprep.subr.bf16.mxu0 %v2914_v32  ;;  %v2924_v32 = vld [vmem:[%s4926_s3 + $0x40] ss:$16 sps:$4 sm:$0xff]  }
  0x9a   : > { %2651 = vmatpush1.bf16.msra.mxu0 %v2918_v10 }
  0xa8   : > { %v641_v11 = vpop.xlane.xlu1 %640 }
  0xa9   : > { %v617_v44 = vpop.xlane.xlu0 %616  ;;  %v817_v13 = vadd.f32 %v4052_v5, %v641_v11  ;;  %v2919_v11 = vld [vmem:[%s4926_s3 + $0x28] ss:$16 sps:$4 sm:$0xff]  }
  0xaa   : > { %v809_v41 = vadd.f32 %v4052_v5, %v617_v44  ;;  %2715 = vmatpush1.bf16.msra.mxu1 %v2919_v11 }
  0xab   : > { %v2355_v12 = vmul.f32 -1.442695, %v817_v13 }
  0xac   : > { %v2347_v4 = vmul.f32 -1.442695, %v809_v41  ;;  %v644_v31 = vpop.xlane.xlu1 %643 }
  0xad   : > { %v620_v26 = vpop.xlane.xlu0 %619  ;;  %3004 = vpow2.f32 %v2355_v12  ;;  %v818_v47 = vadd.f32 %v4052_v5, %v644_v31  ;;  %v2920_v31 = vld [vmem:[%s4926_s3 + $0x44] ss:$16 sps:$4 sm:$0xff]  }
  0xae   : > { %v810_v6 = vadd.f32 %v4052_v5, %v620_v26  ;;  %3006 = vpow2.f32 %v2347_v4  ;;  %v2922_v26 = vld [vmem:[%s4926_s3 + $0x4c] ss:$16 sps:$4 sm:$0xff]   ;;  %2653 = vmatprep.subr.bf16.mxu0 %v2920_v31 }
  0xaf   : > { %v2356_v44 = vmul.f32 -1.442695, %v818_v47  ;;  %2717 = vmatprep.subr.bf16.mxu1 %v2922_v26  ;;  %2655 = vmatpush1.bf16.msra.mxu0 %v2924_v32 }
  0xb0   : > { %v2348_v13 = vmul.f32 -1.442695, %v810_v6  ;;  %v668_v41 = vpop.xlane.xlu1 %667  ;;  %2719 = vmatpush1.bf16.msra.mxu1 %v2925_v46 }
  0xb1   : > { %v665_v12 = vpop.xlane.xlu0 %664  ;;  %3008 = vpow2.f32 %v2356_v44  ;;  %v826_v49 = vadd.f32 %v4052_v5, %v668_v41 }
  0xb2   : > { %v825_v4 = vadd.f32 %v4052_v5, %v665_v12  ;;  %3010 = vpow2.f32 %v2348_v13 }
  0xb3   : > { %v2364_v47 = vmul.f32 -1.442695, %v826_v49 }
  0xb4   : > { %v2363_v6 = vmul.f32 -1.442695, %v825_v4  ;;  %v647_v10 = vpop.xlane.xlu1 %646 }
  0xb5   : > { %v623_v11 = vpop.xlane.xlu0 %622  ;;  %3012 = vpow2.f32 %v2364_v47  ;;  %v819_v44 = vadd.f32 %v4052_v5, %v647_v10 }
  0xb6   : > { %v811_v41 = vadd.f32 %v4052_v5, %v623_v11  ;;  %3014 = vpow2.f32 %v2363_v6 }
  0xb7   : > { %v3005_v12 = vpop.eup %3004  ;;  %v2357_v18 = vmul.f32 -1.442695, %v819_v44 }
  0xb8   : > { %v3007_v54 = vpop.eup %3006  ;;  %v1073_v20 = vadd.f32 1.0, %v3005_v12  ;;  %v2349_v2 = vmul.f32 -1.442695, %v811_v41  ;;  %v692_v13 = vpop.xlane.xlu1 %691 }
  0xb9   : > { %v689_v31 = vpop.xlane.xlu0 %688  ;;  %v1065_v26 = vadd.f32 1.0, %v3007_v54  ;;  %3016 = vpow2.f32 %v2357_v18  ;;  %v834_v49 = vadd.f32 %v4052_v5, %v692_v13 }
  0xba   : > { %v833_v4 = vadd.f32 %v4052_v5, %v689_v31  ;;  %3018 = vrcp.f32 %v1073_v20  ;;  %v2926_v31 = vld [vmem:[%s4926_s3 + $0x64] ss:$16 sps:$4 sm:$0xff]  }
  0xbb   : > { %v3009_v32 = vpop.eup %3008  ;;  %3020 = vrcp.f32 %v1065_v26  ;;  %v2372_v46 = vmul.f32 -1.442695, %v834_v49  ;;  %2657 = vmatprep.subr.bf16.mxu0 %v2926_v31 }
  0xbc   : > { %v3011_v47 = vpop.eup %3010  ;;  %v1074_v10 = vadd.f32 1.0, %v3009_v32  ;;  %3022 = vpow2.f32 %v2349_v2  ;;  %v2371_v6 = vmul.f32 -1.442695, %v833_v4  ;;  %v713_v11 = vpop.xlane.xlu1 %712  ;;  %v2928_v32 = vld [vmem:[%s4926_s3 + $0x6c] ss:$16 sps:$4 sm:$0xff]  }
  0xbd   : > { %v671_v44 = vpop.xlane.xlu0 %670  ;;  %v1066_v12 = vadd.f32 1.0, %v3011_v47  ;;  %3024 = vpow2.f32 %v2372_v46  ;;  %v841_v41 = vadd.f32 %v4052_v5, %v713_v11  ;;  %v2930_v46 = vld [vmem:[%s4926_s3 + $0x60] ss:$16 sps:$4 sm:$0xff]   ;;  %2721 = vmatprep.subr.bf16.mxu1 %v2928_v32 }
  0xbe   : > { %v827_v54 = vadd.f32 %v4052_v5, %v671_v44  ;;  %3026 = vrcp.f32 %v1074_v10  ;;  %2659 = vmatpush1.bf16.msra.mxu0 %v2930_v46  ;;  %v2937_v46 = vld [vmem:[%s4926_s3 + $0x88] ss:$16 sps:$4 sm:$0xff]  }
  0xbf   : > { %v3013_v18 = vpop.eup %3012  ;;  %3028 = vrcp.f32 %v1066_v12  ;;  %v2379_v13 = vmul.f32 -1.442695, %v841_v41 }
  0xc0   : > { %v2365_v20 = vmul.f32 -1.442695, %v827_v54  ;;  %v3015_v26 = vpop.eup %3014  ;;  %v1082_v2 = vadd.f32 1.0, %v3013_v18  ;;  %3030 = vpow2.f32 %v2371_v6  ;;  %v626_v49 = vpop.xlane.xlu1 %625  ;;  %v2931_v6 = vld [vmem:[%s4926_s3 + $0x68] ss:$16 sps:$4 sm:$0xff]  }
  0xc1   : > { %v716_v4 = vpop.xlane.xlu0 %715  ;;  %v1081_v47 = vadd.f32 1.0, %v3015_v26  ;;  %3032 = vpow2.f32 %v2379_v13  ;;  %v812_v10 = vadd.f32 %v4052_v5, %v626_v49  ;;  %2723 = vmatpush1.bf16.msra.mxu1 %v2931_v6  ;;  %v2932_v54 = vld [vmem:[%s4926_s3 + $0x84] ss:$16 sps:$4 sm:$0xff]   ;;  %v2936_v49 = vld [vmem:[%s4926_s3 + $0x80] ss:$16 sps:$4 sm:$0xff]  }
  0xc2   : > { %v842_v11 = vadd.f32 %v4052_v5, %v716_v4  ;;  %3034 = vrcp.f32 %v1082_v2  ;;  %v2934_v2 = vld [vmem:[%s4926_s3 + $0x8c] ss:$16 sps:$4 sm:$0xff]   ;;  %2661 = vmatprep.subr.bf16.mxu0 %v2932_v54 }
  0xc3   : > { %v3017_v44 = vpop.eup %3016  ;;  %3036 = vrcp.f32 %v1081_v47  ;;  %v2350_v12 = vmul.f32 -1.442695, %v812_v10  ;;  %v5142_v47 = vunpack.c.l.bf16 %v3343_v7  ;;  %2725 = vmatprep.subr.bf16.mxu1 %v2934_v2  ;;  %2663 = vmatpush1.bf16.msra.mxu0 %v2936_v49 }
  0xc4   : > { %v2380_v41 = vmul.f32 -1.442695, %v842_v11  ;;  %v3019_v18 = vpop.eup %3018  ;;  %v1075_v13 = vadd.f32 1.0, %v3017_v44  ;;  %3038 = vpow2.f32 %v2365_v20  ;;  %v695_v31 = vpop.xlane.xlu1 %694  ;;  %v5143_v44 = vunpack.c.h.bf16 %v3343_v7 }
  0xc5   : > { %v650_v26 = vpop.xlane.xlu0 %649  ;;  %v3021_v4 = vpop.eup %3020  ;;  %3040 = vpow2.f32 %v2350_v12  ;;  %v835_v32 = vadd.f32 %v4052_v5, %v695_v31  ;;  %v1273_v10 = vmul.f32 %v3019_v18, %v5142_v47  ;;  %2727 = vmatpush1.bf16.msra.mxu1 %v2937_v46  ;;  %v2938_v31 = vld [vmem:[%s4926_s3 + $0xa4] ss:$16 sps:$4 sm:$0xff]   ;;  %v5144_v47 = vunpack.c.l.bf16 %v3346_v8 }
  0xc6   : > { %v3023_v20 = vpop.eup %3022  ;;  %3042 = vrcp.f32 %v1075_v13  ;;  %v820_v11 = vadd.f32 %v4052_v5, %v650_v26  ;;  %v1274_v12 = vmul.f32 %v3019_v18, %v5143_v44  ;;  %v5145_v26 = vunpack.c.h.bf16 %v3346_v8  ;;  %2665 = vmatprep.subr.bf16.mxu0 %v2938_v31  ;;  %v2942_v8 = vld [vmem:[%s4926_s3 + $0xa0] ss:$16 sps:$4 sm:$0xff]  }
  0xc7   : > { %v3025_v6 = vpop.eup %3024  ;;  %v1067_v42 = vadd.f32 1.0, %v3023_v20  ;;  %3044 = vpow2.f32 %v2380_v41  ;;  %v2373_v54 = vmul.f32 -1.442695, %v835_v32  ;;  %v1257_v13 = vmul.f32 %v3021_v4, %v5144_v47  ;;  %v2940_v41 = vld [vmem:[%s4926_s3 + $0xac] ss:$16 sps:$4 sm:$0xff]   ;;  %2667 = vmatpush1.bf16.msra.mxu0 %v2942_v8 }
  0xc8   : > { %v3027_v1 = vpop.eup %3026  ;;  %v1258_v2 = vmul.f32 %v3021_v4, %v5145_v26  ;;  %v1090_v49 = vadd.f32 1.0, %v3025_v6  ;;  %v2358_v37 = vmul.f32 -1.442695, %v820_v11  ;;  %v740_v43 = vpop.xlane.xlu1 %739  ;;  %v5146_v32 = vunpack.c.l.bf16 %v3349_v9  ;;  %v2943_v4 = vld [vmem:[%s4926_s3 + $0xa8] ss:$16 sps:$4 sm:$0xff]   ;;  %2729 = vmatprep.subr.bf16.mxu1 %v2940_v41  ;;  %2669 = vmatprep.subr.bf16.mxu0 %v2944_v55 }
  0xc9   : > { %v737_v7 = vpop.xlane.xlu0 %736  ;;  %v3029_v18 = vpop.eup %3028  ;;  %v5147_v20 = vunpack.c.h.bf16 %v3349_v9  ;;  %3046 = vrcp.f32 %v1067_v42  ;;  %v850_v47 = vadd.f32 %v4052_v5, %v740_v43  ;;  %v5148_v6 = vunpack.c.l.bf16 %v3356_v14  ;;  %2731 = vmatpush1.bf16.msra.mxu1 %v2943_v4  ;;  %v2950_v55 = vld [vmem:[%s4926_s3 + $0xe4] ss:$16 sps:$4 sm:$0xff]  }
  0xca   : > { %v1275_v46 = vmul.f32 %v3027_v1, %v5146_v32  ;;  %v3031_v11 = vpop.eup %3030  ;;  %v5149_v32 = vunpack.c.h.bf16 %v3356_v14  ;;  %3048 = vrcp.f32 %v1090_v49  ;;  %v849_v42 = vadd.f32 %v4052_v5, %v737_v7  ;;  %v2946_v14 = vld [vmem:[%s4926_s3 + $0xcc] ss:$16 sps:$4 sm:$0xff]  }
  0xcb   : > { %v1276_v44 = vmul.f32 %v3027_v1, %v5147_v20  ;;  %v1259_v26 = vmul.f32 %v3029_v18, %v5148_v6  ;;  %v3033_v1 = vpop.eup %3032  ;;  %v1089_v20 = vadd.f32 1.0, %v3031_v11  ;;  %3050 = vpow2.f32 %v2373_v54  ;;  %v2948_v54 = vld [vmem:[%s4926_s3 + $0xc0] ss:$16 sps:$4 sm:$0xff]   ;;  %2733 = vmatprep.subr.bf16.mxu1 %v2946_v14 }
  0xcc   : > { %v1260_v9 = vmul.f32 %v3029_v18, %v5149_v32  ;;  %v1411_v43 = vadd.f32 %v1275_v46, %v1273_v10  ;;  %v3035_v18 = vpop.eup %3034  ;;  %v1097_v41 = vadd.f32 1.0, %v3033_v1  ;;  %3052 = vpow2.f32 %v2358_v37  ;;  %v719_v10 = vpop.xlane.xlu1 %718  ;;  %v2949_v46 = vld [vmem:[%s4926_s3 + $0xc8] ss:$16 sps:$4 sm:$0xff]   ;;  %2671 = vmatpush1.bf16.msra.mxu0 %v2948_v54 }
  0xcd   : > { %v1424_v31 = vadd.f32 %v1276_v44, %v1274_v12  ;;  %v4160_v49 = vadd.f32 %v1259_v26, %v1257_v13  ;;  %v674_v12 = vpop.xlane.xlu0 %673  ;;  %v3037_v44 = vpop.eup %3036  ;;  %v5150_v8 = vunpack.c.l.bf16 %v3363_v19  ;;  %v5151_v13 = vunpack.c.h.bf16 %v3363_v19  ;;  %2735 = vmatpush1.bf16.msra.mxu1 %v2949_v46  ;;  %2673 = vmatprep.subr.bf16.mxu0 %v2950_v55 }
  0xce   : > { %v4162_v7 = vadd.f32 %v1260_v9, %v1258_v2  ;;  %3054 = vrcp.f32 %v1089_v20  ;;  %v2388_v11 = vmul.f32 -1.442695, %v850_v47  ;;  %v3039_v37 = vpop.eup %3038  ;;  %v5152_v6 = vunpack.c.l.bf16 %v3378_v24 }
  0xcf   : > { %v1291_v4 = vmul.f32 %v3035_v18, %v5150_v8  ;;  %v1292_v2 = vmul.f32 %v3035_v18, %v5151_v13  ;;  %v5153_v32 = vunpack.c.h.bf16 %v3378_v24  ;;  %3056 = vrcp.f32 %v1097_v41  ;;  %v3041_v36 = vpop.eup %3040  ;;  %v2952_v24 = vld [vmem:[%s4926_s3 + $0xec] ss:$16 sps:$4 sm:$0xff]  }
  0xd0   : > { %v1289_v26 = vmul.f32 %v3037_v44, %v5152_v6  ;;  %v2387_v1 = vmul.f32 -1.442695, %v849_v42  ;;  %v1083_v15 = vadd.f32 1.0, %v3039_v37  ;;  %3058 = vpow2.f32 %v2388_v11  ;;  %v3043_v47 = vpop.eup %3042  ;;  %v764_v18 = vpop.xlane.xlu1 %763  ;;  %2737 = vmatprep.subr.bf16.mxu1 %v2952_v24 }
  0xd1   : > { %v1290_v9 = vmul.f32 %v3037_v44, %v5153_v32  ;;  %v843_v8 = vadd.f32 %v4052_v5, %v719_v10  ;;  %v828_v19 = vadd.f32 %v4052_v5, %v674_v12  ;;  %v1068_v14 = vadd.f32 1.0, %v3041_v36  ;;  %v761_v41 = vpop.xlane.xlu0 %760  ;;  %v2954_v10 = vld [vmem:[%s4926_s3 + $0xe0] ss:$16 sps:$4 sm:$0xff]   ;;  %v2955_v12 = vld [vmem:[%s4926_s3 + $0xe8] ss:$16 sps:$4 sm:$0xff]   ;;  %v3045_v54 = vpop.eup %3044 }
  0xd2   : > { %v4186_v20 = vadd.f32 %v1291_v4, %v1289_v26  ;;  %3060 = vpow2.f32 %v2387_v1  ;;  %v5154_v46 = vunpack.c.l.bf16 %v3393_v29  ;;  %v5155_v4 = vunpack.c.h.bf16 %v3393_v29  ;;  %2675 = vmatpush1.bf16.msra.mxu0 %v2954_v10  ;;  %2739 = vmatpush1.bf16.msra.mxu1 %v2955_v12  ;;  %v2958_v29 = vld [vmem:[%s4926_s3 + $0x10c] ss:$16 sps:$4 sm:$0xff]  }
  0xd3   : > { %v4188_v42 = vadd.f32 %v1292_v2, %v1290_v9  ;;  %3062 = vrcp.f32 %v1083_v15  ;;  %v2381_v36 = vmul.f32 -1.442695, %v843_v8  ;;  %v1098_v2 = vadd.f32 1.0, %v3045_v54  ;;  %v3047_v6 = vpop.eup %3046  ;;  %v2956_v15 = vld [vmem:[%s4926_s3 + $0x104] ss:$16 sps:$4 sm:$0xff]   ;;  %2741 = vmatprep.subr.bf16.mxu1 %v2958_v29 }
  0xd4   : > { %v1277_v44 = vmul.f32 %v3043_v47, %v5154_v46  ;;  %v1278_v13 = vmul.f32 %v3043_v47, %v5155_v4  ;;  %3064 = vrcp.f32 %v1068_v14  ;;  %v2366_v11 = vmul.f32 -1.442695, %v828_v19  ;;  %v3049_v1 = vpop.eup %3048  ;;  %v653_v24 = vpop.xlane.xlu1 %652  ;;  %v2960_v14 = vld [vmem:[%s4926_s3 + $0x100] ss:$16 sps:$4 sm:$0xff]   ;;  %2677 = vmatprep.subr.bf16.mxu0 %v2956_v15 }
  0xd5   : > { %v858_v37 = vadd.f32 %v4052_v5, %v764_v18  ;;  %3066 = vpow2.f32 %v2381_v36  ;;  %v857_v9 = vadd.f32 %v4052_v5, %v761_v41  ;;  %v5156_v8 = vunpack.c.l.bf16 %v3398_v34  ;;  %v629_v47 = vpop.xlane.xlu0 %628  ;;  %v2961_v18 = vld [vmem:[%s4926_s3 + $0x108] ss:$16 sps:$4 sm:$0xff]   ;;  %v3051_v41 = vpop.eup %3050 }
  0xd6   : > { %v4201_v26 = vadd.f32 %v1411_v43, %v1277_v44  ;;  %v4203_v32 = vadd.f32 %v1424_v31, %v1278_v13  ;;  %v5157_v31 = vunpack.c.h.bf16 %v3398_v34  ;;  %3068 = vrcp.f32 %v1098_v2  ;;  %v3053_v44 = vpop.eup %3052  ;;  %2679 = vmatpush1.bf16.msra.mxu0 %v2960_v14  ;;  %2743 = vmatpush1.bf16.msra.mxu1 %v2961_v18 }
  0xd7   : > { %v1261_v43 = vmul.f32 %v3047_v6, %v5156_v8  ;;  %v2396_v55 = vmul.f32 -1.442695, %v858_v37  ;;  %v5158_v10 = vunpack.c.l.bf16 %v3403_v39  ;;  %v5159_v54 = vunpack.c.h.bf16 %v3403_v39 }
  0xd8   : > { %v1262_v19 = vmul.f32 %v3047_v6, %v5157_v31  ;;  %3070 = vpow2.f32 %v2366_v11  ;;  %v2395_v46 = vmul.f32 -1.442695, %v857_v9  ;;  %v1091_v36 = vadd.f32 1.0, %v3051_v41  ;;  %v3055_v2 = vpop.eup %3054  ;;  %v2962_v11 = vld [vmem:[%s4926_s3 + $0x124] ss:$16 sps:$4 sm:$0xff]   ;;  %v743_v8 = vpop.xlane.xlu1 %742 }
  0xd9   : > { %v1307_v12 = vmul.f32 %v3049_v1, %v5158_v10  ;;  %v1308_v34 = vmul.f32 %v3049_v1, %v5159_v54  ;;  %v4227_v4 = vadd.f32 %v4160_v49, %v1261_v43  ;;  %3072 = vpow2.f32 %v2396_v55  ;;  %v2964_v49 = vld [vmem:[%s4926_s3 + $0x12c] ss:$16 sps:$4 sm:$0xff]   ;;  %v698_v43 = vpop.xlane.xlu0 %697  ;;  %v2966_v31 = vld [vmem:[%s4926_s3 + $0x120] ss:$16 sps:$4 sm:$0xff]   ;;  %2681 = vmatprep.subr.bf16.mxu0 %v2962_v11 }
  0xda   : > { %v4230_v13 = vadd.f32 %v4162_v7, %v1262_v19  ;;  %v1076_v37 = vadd.f32 1.0, %v3053_v44  ;;  %3074 = vpow2.f32 %v2395_v46  ;;  %v821_v6 = vadd.f32 %v4052_v5, %v653_v24  ;;  %v3057_v7 = vpop.eup %3056  ;;  %v2967_v19 = vld [vmem:[%s4926_s3 + $0x128] ss:$16 sps:$4 sm:$0xff]   ;;  %2745 = vmatprep.subr.bf16.mxu1 %v2964_v49  ;;  %2683 = vmatpush1.bf16.msra.mxu0 %v2966_v31 }
  0xdb   : > { %v813_v39 = vadd.f32 %v4052_v5, %v629_v47  ;;  %v5160_v9 = vunpack.c.l.bf16 %v3422_v48  ;;  %v5161_v29 = vunpack.c.h.bf16 %v3422_v48  ;;  %3076 = vrcp.f32 %v1091_v36  ;;  %v3059_v55 = vpop.eup %3058  ;;  %2747 = vmatpush1.bf16.msra.mxu1 %v2967_v19 }
  0xdc   : > { %v5162_v24 = vunpack.c.l.bf16 %v3441_v59  ;;  %3078 = vrcp.f32 %v1076_v37  ;;  %v2359_v14 = vmul.f32 -1.442695, %v821_v6  ;;  %v3061_v48 = vpop.eup %3060  ;;  %v1106_v10 = vadd.f32 1.0, %v3059_v55  ;;  %v2968_v37 = vld [vmem:[%s4926_s3 + $0x144] ss:$16 sps:$4 sm:$0xff]  }
  0xdd   : > { %v1305_v15 = vmul.f32 %v3055_v2, %v5160_v9  ;;  %v1306_v1 = vmul.f32 %v3055_v2, %v5161_v29  ;;  %v2351_v54 = vmul.f32 -1.442695, %v813_v39  ;;  %v3063_v46 = vpop.eup %3062  ;;  %v5163_v44 = vunpack.c.h.bf16 %v3441_v59  ;;  %v2972_v29 = vld [vmem:[%s4926_s3 + $0x140] ss:$16 sps:$4 sm:$0xff]   ;;  %2685 = vmatprep.subr.bf16.mxu0 %v2968_v37 }
  0xde   : > { %v1321_v47 = vmul.f32 %v3057_v7, %v5162_v24  ;;  %v1105_v2 = vadd.f32 1.0, %v3061_v48  ;;  %3080 = vpow2.f32 %v2359_v14  ;;  %v851_v9 = vadd.f32 %v4052_v5, %v743_v8  ;;  %2687 = vmatpush1.bf16.msra.mxu0 %v2972_v29 }
  0xdf   : > { %v4252_v18 = vadd.f32 %v1307_v12, %v1305_v15  ;;  %v4254_v41 = vadd.f32 %v1308_v34, %v1306_v1  ;;  %v1322_v36 = vmul.f32 %v3057_v7, %v5163_v44  ;;  %v2970_v12 = vld [vmem:[%s4926_s3 + $0x14c] ss:$16 sps:$4 sm:$0xff]   ;;  %v3065_v34 = vpop.eup %3064  ;;  %v5164_v6 = vunpack.c.l.bf16 %v3444_v60  ;;  %v788_v7 = vpop.xlane.xlu1 %787  ;;  %v2973_v1 = vld [vmem:[%s4926_s3 + $0x148] ss:$16 sps:$4 sm:$0xff]  }
  0xe0   : > { %v5165_v59 = vunpack.c.h.bf16 %v3444_v60  ;;  %3082 = vrcp.f32 %v1106_v10  ;;  %v836_v49 = vadd.f32 %v4052_v5, %v698_v43  ;;  %v785_v15 = vpop.xlane.xlu0 %784  ;;  %v3067_v8 = vpop.eup %3066  ;;  %v5166_v31 = vunpack.c.l.bf16 %v3454_v22  ;;  %2749 = vmatprep.subr.bf16.mxu1 %v2970_v12  ;;  %v2978_v12 = vld [vmem:[%s4926_s3 + $0x160] ss:$16 sps:$4 sm:$0xff]  }
  0xe1   : > { %v1293_v39 = vmul.f32 %v3063_v46, %v5164_v6  ;;  %v5167_v60 = vunpack.c.h.bf16 %v3454_v22  ;;  %3084 = vrcp.f32 %v1105_v2  ;;  %v2389_v24 = vmul.f32 -1.442695, %v851_v9  ;;  %v3069_v43 = vpop.eup %3068  ;;  %v2976_v22 = vld [vmem:[%s4926_s3 + $0x16c] ss:$16 sps:$4 sm:$0xff]   ;;  %2751 = vmatpush1.bf16.msra.mxu1 %v2973_v1 }
  0xe2   : > { %v1294_v11 = vmul.f32 %v3063_v46, %v5165_v59  ;;  %v1263_v19 = vmul.f32 %v3065_v34, %v5166_v31  ;;  %v1099_v10 = vadd.f32 1.0, %v3067_v8  ;;  %3086 = vpow2.f32 %v2351_v54  ;;  %v2974_v46 = vld [vmem:[%s4926_s3 + $0x164] ss:$16 sps:$4 sm:$0xff]   ;;  %v3071_v44 = vpop.eup %3070  ;;  %2753 = vmatprep.subr.bf16.mxu1 %v2976_v22  ;;  %v2984_v22 = vld [vmem:[%s4926_s3 + $0x180] ss:$16 sps:$4 sm:$0xff]  }
  0xe3   : > { %v1264_v55 = vmul.f32 %v3065_v34, %v5167_v60  ;;  %v4281_v14 = vadd.f32 %v4186_v20, %v1293_v39  ;;  %v5169_v54 = vunpack.c.h.bf16 %v3466_v27  ;;  %v2979_v34 = vld [vmem:[%s4926_s3 + $0x168] ss:$16 sps:$4 sm:$0xff]   ;;  %v1084_v6 = vadd.f32 1.0, %v3071_v44  ;;  %v722_v59 = vpop.xlane.xlu1 %721  ;;  %2689 = vmatprep.subr.bf16.mxu0 %v2974_v46 }
  0xe4   : > { %v4284_v48 = vadd.f32 %v4188_v42, %v1294_v11  ;;  %v4293_v2 = vadd.f32 %v4227_v4, %v1263_v19  ;;  %v5168_v42 = vunpack.c.l.bf16 %v3466_v27  ;;  %v3073_v4 = vpop.eup %3072  ;;  %3088 = vrcp.f32 %v1099_v10  ;;  %v677_v11 = vpop.xlane.xlu0 %676  ;;  %v2980_v27 = vld [vmem:[%s4926_s3 + $0x184] ss:$16 sps:$4 sm:$0xff]   ;;  %2691 = vmatpush1.bf16.msra.mxu0 %v2978_v12 }
  0xe5   : > { %v4296_v20 = vadd.f32 %v4230_v13, %v1264_v55  ;;  %v1324_v37 = vmul.f32 %v3069_v43, %v5169_v54  ;;  %v2374_v13 = vmul.f32 -1.442695, %v836_v49  ;;  %v866_v39 = vadd.f32 %v4052_v5, %v788_v7  ;;  %v3075_v29 = vpop.eup %3074  ;;  %v2982_v49 = vld [vmem:[%s4926_s3 + $0x18c] ss:$16 sps:$4 sm:$0xff]   ;;  %2755 = vmatpush1.bf16.msra.mxu1 %v2979_v34  ;;  %2693 = vmatprep.subr.bf16.mxu0 %v2980_v27  ;;  %v2986_v12 = vld [vmem:[%s4926_s3 + $0x1a4] ss:$16 sps:$4 sm:$0xff]  }
  0xe6   : > { %v1323_v9 = vmul.f32 %v3069_v43, %v5168_v42  ;;  %v1114_v19 = vadd.f32 1.0, %v3073_v4  ;;  %3090 = vpow2.f32 %v2389_v24  ;;  %v3077_v7 = vpop.eup %3076  ;;  %v1113_v1 = vadd.f32 1.0, %v3075_v29  ;;  %2757 = vmatprep.subr.bf16.mxu1 %v2982_v49  ;;  %v2988_v34 = vld [vmem:[%s4926_s3 + $0x1ac] ss:$16 sps:$4 sm:$0xff]  }
  0xe7   : > { %v4314_v31 = vadd.f32 %v1324_v37, %v1322_v36  ;;  %3092 = vrcp.f32 %v1084_v6  ;;  %v2404_v60 = vmul.f32 -1.442695, %v866_v39  ;;  %v865_v55 = vadd.f32 %v4052_v5, %v785_v15  ;;  %v3079_v43 = vpop.eup %3078  ;;  %v632_v54 = vpop.xlane.xlu1 %631 }
  0xe8   : > { %v4312_v8 = vadd.f32 %v1323_v9, %v1321_v47  ;;  %v5170_v10 = vunpack.c.l.bf16 %v3485_v50  ;;  %v5171_v36 = vunpack.c.h.bf16 %v3485_v50  ;;  %3094 = vrcp.f32 %v1114_v19  ;;  %v767_v37 = vpop.xlane.xlu0 %766  ;;  %v2985_v50 = vld [vmem:[%s4926_s3 + $0x188] ss:$16 sps:$4 sm:$0xff]   ;;  %v3081_v4 = vpop.eup %3080  ;;  %2695 = vmatpush1.bf16.msra.mxu0 %v2984_v22 }
  0xe9   : > { %v844_v24 = vadd.f32 %v4052_v5, %v722_v59  ;;  %v5172_v44 = vunpack.c.l.bf16 %v3488_v52  ;;  %v5173_v15 = vunpack.c.h.bf16 %v3488_v52  ;;  %3096 = vrcp.f32 %v1113_v1  ;;  %2759 = vmatpush1.bf16.msra.mxu1 %v2985_v50  ;;  %2697 = vmatprep.subr.bf16.mxu0 %v2986_v12 }
  0xea   : > { %v1309_v47 = vmul.f32 %v3077_v7, %v5170_v10  ;;  %v1310_v46 = vmul.f32 %v3077_v7, %v5171_v36  ;;  %3098 = vpow2.f32 %v2374_v13  ;;  %v2403_v39 = vmul.f32 -1.442695, %v865_v55  ;;  %v3083_v59 = vpop.eup %3082  ;;  %2761 = vmatprep.subr.bf16.mxu1 %v2988_v34  ;;  %v2996_v34 = vld [vmem:[%s4926_s3 + $0x1c0] ss:$16 sps:$4 sm:$0xff]  }
  0xeb   : > { %v1279_v42 = vmul.f32 %v3079_v43, %v5172_v44  ;;  %v1280_v9 = vmul.f32 %v3079_v43, %v5173_v15  ;;  %v1077_v19 = vadd.f32 1.0, %v3081_v4  ;;  %v3085_v7 = vpop.eup %3084  ;;  %v5175_v13 = vunpack.c.h.bf16 %v3491_v53 }
  0xec   : > { %v4339_v6 = vadd.f32 %v4252_v18, %v1309_v47  ;;  %v4342_v52 = vadd.f32 %v4254_v41, %v1310_v46  ;;  %v2382_v18 = vmul.f32 -1.442695, %v844_v24  ;;  %v5174_v41 = vunpack.c.l.bf16 %v3491_v53  ;;  %v3087_v43 = vpop.eup %3086  ;;  %v701_v53 = vpop.xlane.xlu1 %700 }
  0xed   : > { %v4348_v27 = vadd.f32 %v4201_v26, %v1279_v42  ;;  %v4351_v29 = vadd.f32 %v4203_v32, %v1280_v9  ;;  %v1340_v49 = vmul.f32 %v3083_v59, %v5175_v13  ;;  %3100 = vpow2.f32 %v2404_v60  ;;  %v2990_v26 = vld [vmem:[%s4926_s3 + $0x1a0] ss:$16 sps:$4 sm:$0xff]   ;;  %v656_v24 = vpop.xlane.xlu0 %655  ;;  %v2992_v60 = vld [vmem:[%s4926_s3 + $0x1c4] ss:$16 sps:$4 sm:$0xff]   ;;  %v2994_v42 = vld [vmem:[%s4926_s3 + $0x1cc] ss:$16 sps:$4 sm:$0xff]  }
  0xee   : > { %v1339_v1 = vmul.f32 %v3083_v59, %v5174_v41  ;;  %v829_v55 = vadd.f32 %v4052_v5, %v677_v11  ;;  %v5176_v32 = vunpack.c.l.bf16 %v3500_v61  ;;  %v5177_v47 = vunpack.c.h.bf16 %v3500_v61  ;;  %v2991_v11 = vld [vmem:[%s4926_s3 + $0x1a8] ss:$16 sps:$4 sm:$0xff]   ;;  %v3089_v15 = vpop.eup %3088  ;;  %2699 = vmatpush1.bf16.msra.mxu0 %v2990_v26 }
  0xef   : > { %3102 = vrcp.f32 %v1077_v19  ;;  %v814_v46 = vadd.f32 %v4052_v5, %v632_v54  ;;  %v1069_v22 = vadd.f32 1.0, %v3087_v43  ;;  %v859_v61 = vadd.f32 %v4052_v5, %v767_v37  ;;  %v2997_v19 = vld [vmem:[%s4926_s3 + $0x1c8] ss:$16 sps:$4 sm:$0xff]   ;;  %2763 = vmatpush1.bf16.msra.mxu1 %v2991_v11  ;;  %2701 = vmatprep.subr.bf16.mxu0 %v2992_v60 }
  0xf0   : > { %v1337_v10 = vmul.f32 %v3085_v7, %v5176_v32  ;;  %v1338_v36 = vmul.f32 %v3085_v7, %v5177_v47  ;;  %3104 = vpow2.f32 %v2403_v39  ;;  %v2367_v44 = vmul.f32 -1.442695, %v829_v55  ;;  %v3091_v50 = vpop.eup %3090  ;;  %v791_v13 = vpop.xlane.xlu1 %790  ;;  %2765 = vmatprep.subr.bf16.mxu1 %v2994_v42 }
  0xf1   : > { %3106 = vpow2.f32 %v2382_v18  ;;  %v5178_v12 = vunpack.c.l.bf16 %v3513_v35  ;;  %v5179_v39 = vunpack.c.h.bf16 %v3513_v35  ;;  %v2352_v37 = vmul.f32 -1.442695, %v814_v46  ;;  %v3093_v7 = vpop.eup %3092  ;;  %v746_v35 = vpop.xlane.xlu0 %745  ;;  %v3000_v46 = vld [vmem:[%s4926_s3 + $0x1ec] ss:$16 sps:$4 sm:$0xff]  }
  0xf2   : > { %v4376_v9 = vadd.f32 %v1339_v1, %v1337_v10  ;;  %v4378_v54 = vadd.f32 %v1340_v49, %v1338_v36  ;;  %3108 = vrcp.f32 %v1069_v22  ;;  %v1107_v18 = vadd.f32 1.0, %v3091_v50  ;;  %v2998_v49 = vld [vmem:[%s4926_s3 + $0x1e4] ss:$16 sps:$4 sm:$0xff]   ;;  %v3095_v55 = vpop.eup %3094  ;;  %2703 = vmatpush1.bf16.msra.mxu0 %v2996_v34 }
  0xf3   : > { %v1325_v4 = vmul.f32 %v3089_v15, %v5178_v12  ;;  %v1326_v59 = vmul.f32 %v3089_v15, %v5179_v39  ;;  %3110 = vpow2.f32 %v2367_v44  ;;  %v2397_v41 = vmul.f32 -1.442695, %v859_v61  ;;  %2767 = vmatpush1.bf16.msra.mxu1 %v2997_v19  ;;  %2705 = vmatprep.subr.bf16.mxu0 %v2998_v49 }
  0xf4   : > { %v837_v1 = vadd.f32 %v4052_v5, %v701_v53  ;;  %v5180_v32 = vunpack.c.l.bf16 %v3526_v28  ;;  %v5181_v47 = vunpack.c.h.bf16 %v3526_v28  ;;  %v3097_v53 = vpop.eup %3096  ;;  %v5182_v11 = vunpack.c.l.bf16 %v3542_v63  ;;  %v725_v39 = vpop.xlane.xlu1 %724  ;;  %2769 = vmatprep.subr.bf16.mxu1 %v3000_v46 }
  0xf5   : > { %v4395_v26 = vadd.f32 %v4312_v8, %v1325_v4  ;;  %v4398_v43 = vadd.f32 %v4314_v31, %v1326_v59  ;;  %v5183_v8 = vunpack.c.h.bf16 %v3542_v63  ;;  %3112 = vrcp.f32 %v1107_v18  ;;  %v3099_v44 = vpop.eup %3098  ;;  %v3002_v63 = vld [vmem:[%s4926_s3 + $0x1e0] ss:$16 sps:$4 sm:$0xff]  }
  0xf6   : > { %v1295_v10 = vmul.f32 %v3093_v7, %v5180_v32  ;;  %v1296_v36 = vmul.f32 %v3093_v7, %v5181_v47  ;;  %v1355_v60 = vmul.f32 %v3095_v55, %v5182_v11  ;;  %v822_v31 = vadd.f32 %v4052_v5, %v656_v24  ;;  %2707 = vmatpush1.bf16.msra.mxu0 %v3002_v63  ;;  %v2550_v47 = vld [vmem:[%s4928_s5 + $0x40] sm:$0xff]  }
  0xf7   : > { %v1356_v22 = vmul.f32 %v3095_v55, %v5183_v8  ;;  %v5184_v42 = vunpack.c.l.bf16 %v3552_v21  ;;  %v5185_v50 = vunpack.c.h.bf16 %v3552_v21  ;;  %v1092_v4 = vadd.f32 1.0, %v3099_v44  ;;  %v3101_v59 = vpop.eup %3100  ;;  %2773 = vmatprep.subr.bf16.mxu0 %v2550_v47 }
  0xf8   : > { %v4413_v61 = vadd.f32 %v4281_v14, %v1295_v10  ;;  %v4416_v28 = vadd.f32 %v4284_v48, %v1296_v36  ;;  %v867_v24 = vadd.f32 %v4052_v5, %v791_v13  ;;  %v680_v14 = vpop.xlane.xlu0 %679  ;;  %v3003_v48 = vld [vmem:[%s4926_s3 + $0x1e8] ss:$16 sps:$4 sm:$0xff]   ;;  %3114 = vpow2.f32 %v2352_v37  ;;  %v2566_v37 = vld [vmem:[%s4928_s5 + $0xc0] sm:$0xff]   ;;  %v635_v46 = vpop.xlane.xlu1 %634 }
  0xf9   : > { %v1353_v15 = vmul.f32 %v3097_v53, %v5184_v42  ;;  %v1354_v12 = vmul.f32 %v3097_v53, %v5185_v50  ;;  %v2375_v34 = vmul.f32 -1.442695, %v837_v1  ;;  %v3103_v18 = vpop.eup %3102  ;;  %3116 = vrcp.f32 %v1092_v4  ;;  %2771 = vmatpush1.bf16.msra.mxu1 %v3003_v48 }
  0xfa   : > { %v3105_v55 = vpop.eup %3104  ;;  %v5186_v13 = vunpack.c.l.bf16 %v3557_v0  ;;  %v5187_v19 = vunpack.c.h.bf16 %v3557_v0  ;;  %3118 = vpow2.f32 %v2397_v41  ;;  %v2360_v10 = vmul.f32 -1.442695, %v822_v31  ;;  %2805 = vmatprep.subr.bf16.mxu1 %v2566_v37 }
  0xfb   : > { %v4429_v7 = vadd.f32 %v1355_v60, %v1353_v15  ;;  %v4431_v21 = vadd.f32 %v1356_v22, %v1354_v12  ;;  %v3107_v1 = vpop.eup %3106  ;;  %v2405_v36 = vmul.f32 -1.442695, %v867_v24  ;;  %3120 = vpow2.f32 %v2375_v34 }
  0xfc   : > { %v1281_v32 = vmul.f32 %v3103_v18, %v5186_v13  ;;  %v1282_v49 = vmul.f32 %v3103_v18, %v5187_v19  ;;  %v770_v53 = vpop.xlane.xlu0 %769  ;;  %v3109_v11 = vpop.eup %3108  ;;  %v852_v60 = vadd.f32 %v4052_v5, %v746_v35  ;;  %v5188_v22 = vunpack.c.l.bf16 %v3560_v58 }
  0xfd   : > { %v3111_v8 = vpop.eup %3110  ;;  %v5189_v44 = vunpack.c.h.bf16 %v3560_v58  ;;  %v1122_v15 = vadd.f32 1.0, %v3101_v59  ;;  %v1121_v50 = vadd.f32 1.0, %v3105_v55  ;;  %v1100_v12 = vadd.f32 1.0, %v3107_v1  ;;  %v704_v24 = vpop.xlane.xlu1 %703 }
  0xfe   : > { %v4444_v0 = vadd.f32 %v4348_v27, %v1281_v32  ;;  %v4447_v41 = vadd.f32 %v4351_v29, %v1282_v49  ;;  %v1265_v31 = vmul.f32 %v3109_v11, %v5188_v22  ;;  %3122 = vpow2.f32 %v2360_v10 }
  0xff   : > { %v1266_v42 = vmul.f32 %v3109_v11, %v5189_v44  ;;  %v845_v27 = vadd.f32 %v4052_v5, %v725_v39  ;;  %v3113_v63 = vpop.eup %3112  ;;  %3124 = vpow2.f32 %v2405_v36  ;;  %v830_v4 = vadd.f32 %v4052_v5, %v680_v14 }
 0x100   : > { %v4456_v29 = vadd.f32 %v4293_v2, %v1265_v31  ;;  %v659_v48 = vpop.xlane.xlu0 %658  ;;  %v5190_v58 = vunpack.c.l.bf16 %v3589_v3  ;;  %v5191_v34 = vunpack.c.h.bf16 %v3589_v3  ;;  %v2390_v55 = vmul.f32 -1.442695, %v852_v60 }
 0x101   : > { %v4459_v35 = vadd.f32 %v4296_v20, %v1266_v42  ;;  %3126 = vrcp.f32 %v1122_v15  ;;  %v815_v39 = vadd.f32 %v4052_v5, %v635_v46  ;;  %v2383_v14 = vmul.f32 -1.442695, %v845_v27  ;;  %v794_v10 = vpop.xlane.xlu1 %793 }
 0x102   : > { %v1341_v59 = vmul.f32 %v3113_v63, %v5190_v58  ;;  %v1342_v18 = vmul.f32 %v3113_v63, %v5191_v34  ;;  %v3115_v2 = vpop.eup %3114  ;;  %3128 = vrcp.f32 %v1121_v50  ;;  %v1085_v19 = vadd.f32 1.0, %v3111_v8 }
 0x103   : > { %v3117_v32 = vpop.eup %3116  ;;  %3130 = vrcp.f32 %v1100_v12  ;;  %v2368_v49 = vmul.f32 -1.442695, %v830_v4  ;;  %v5192_v37 = vunpack.c.l.bf16 %v3601_v23  ;;  %v5193_v36 = vunpack.c.h.bf16 %v3601_v23 }
 0x104   : > { %v4468_v13 = vadd.f32 %v4376_v9, %v1341_v59  ;;  %v4471_v20 = vadd.f32 %v4378_v54, %v1342_v18  ;;  %v749_v3 = vpop.xlane.xlu0 %748  ;;  %v3119_v47 = vpop.eup %3118  ;;  %3132 = vpow2.f32 %v2390_v55  ;;  %v860_v9 = vadd.f32 %v4052_v5, %v770_v53 }
 0x105   : > { %v1311_v1 = vmul.f32 %v3117_v32, %v5192_v37  ;;  %v1312_v46 = vmul.f32 %v3117_v32, %v5193_v36  ;;  %v1070_v54 = vadd.f32 1.0, %v3115_v2  ;;  %v2353_v11 = vmul.f32 -1.442695, %v815_v39  ;;  %v3121_v60 = vpop.eup %3120  ;;  %v728_v42 = vpop.xlane.xlu1 %727 }
 0x106   : > { %3134 = vpow2.f32 %v2383_v14  ;;  %v838_v31 = vadd.f32 %v4052_v5, %v704_v24  ;;  %v1115_v44 = vadd.f32 1.0, %v3119_v47  ;;  %v2398_v50 = vmul.f32 -1.442695, %v860_v9 }
 0x107   : > { %v4479_v22 = vadd.f32 %v4339_v6, %v1311_v1  ;;  %v4482_v8 = vadd.f32 %v4342_v52, %v1312_v46  ;;  %3136 = vpow2.f32 %v2368_v49  ;;  %v1093_v12 = vadd.f32 1.0, %v3121_v60 }
 0x108   : > { %v683_v23 = vpop.xlane.xlu0 %682  ;;  %v3123_v15 = vpop.eup %3122  ;;  %3138 = vrcp.f32 %v1085_v19  ;;  %v823_v27 = vadd.f32 %v4052_v5, %v659_v48  ;;  %v2376_v6 = vmul.f32 -1.442695, %v838_v31  ;;  %v868_v4 = vadd.f32 %v4052_v5, %v794_v10 }
 0x109   : > { %v3125_v53 = vpop.eup %3124  ;;  %3140 = vrcp.f32 %v1070_v54  ;;  %v1078_v52 = vadd.f32 1.0, %v3123_v15  ;;  %v638_v24 = vpop.xlane.xlu1 %637  ;;  %v853_v18 = vadd.f32 %v4052_v5, %v749_v3  ;;  %v846_v48 = vadd.f32 %v4052_v5, %v728_v42 }
 0x10a   : > { %3142 = vpow2.f32 %v2353_v11  ;;  %v1123_v34 = vadd.f32 1.0, %v3125_v53  ;;  %v2361_v39 = vmul.f32 -1.442695, %v823_v27  ;;  %v5194_v14 = vunpack.c.l.bf16 %v3617_v51 }
 0x10b   : > { %v3127_v63 = vpop.eup %3126  ;;  %3144 = vrcp.f32 %v1115_v44  ;;  %v5195_v19 = vunpack.c.h.bf16 %v3617_v51  ;;  %v2406_v10 = vmul.f32 -1.442695, %v868_v4  ;;  %v5196_v3 = vunpack.c.l.bf16 %v3620_v40 }
 0x10c   : > { %v773_v58 = vpop.xlane.xlu0 %772  ;;  %v3129_v59 = vpop.eup %3128  ;;  %3146 = vpow2.f32 %v2398_v50  ;;  %v1371_v32 = vmul.f32 %v3127_v63, %v5194_v14  ;;  %v5197_v46 = vunpack.c.h.bf16 %v3620_v40  ;;  %v2391_v54 = vmul.f32 -1.442695, %v853_v18 }
 0x10d   : > { %v3131_v55 = vpop.eup %3130  ;;  %3148 = vrcp.f32 %v1093_v12  ;;  %v1372_v49 = vmul.f32 %v3127_v63, %v5195_v19  ;;  %v707_v47 = vpop.xlane.xlu1 %706  ;;  %v1369_v36 = vmul.f32 %v3129_v59, %v5196_v3  ;;  %v5198_v60 = vunpack.c.l.bf16 %v3630_v30 }
 0x10e   : > { %v3133_v2 = vpop.eup %3132  ;;  %3150 = vpow2.f32 %v2376_v6  ;;  %v1370_v9 = vmul.f32 %v3129_v59, %v5197_v46  ;;  %v831_v51 = vadd.f32 %v4052_v5, %v683_v23  ;;  %v2384_v15 = vmul.f32 -1.442695, %v846_v48 }
 0x10f   : > { %3152 = vrcp.f32 %v1078_v52  ;;  %v1327_v31 = vmul.f32 %v3131_v55, %v5198_v60  ;;  %v1108_v44 = vadd.f32 1.0, %v3133_v2  ;;  %v5199_v53 = vunpack.c.h.bf16 %v3630_v30 }
 0x110   : > { %v662_v37 = vpop.xlane.xlu0 %661  ;;  %v3135_v1 = vpop.eup %3134  ;;  %3154 = vrcp.f32 %v1123_v34  ;;  %v816_v40 = vadd.f32 %v4052_v5, %v638_v24  ;;  %v4503_v4 = vadd.f32 %v1371_v32, %v1369_v36  ;;  %v4505_v59 = vadd.f32 %v1372_v49, %v1370_v9 }
 0x111   : > { %v3137_v11 = vpop.eup %3136  ;;  %3156 = vpow2.f32 %v2361_v39  ;;  %v1328_v12 = vmul.f32 %v3131_v55, %v5199_v53  ;;  %v1101_v27 = vadd.f32 1.0, %v3135_v1  ;;  %v797_v6 = vpop.xlane.xlu1 %796  ;;  %v4508_v18 = vadd.f32 %v4395_v26, %v1327_v31 }
 0x112   : > { %v3139_v42 = vpop.eup %3138  ;;  %3158 = vpow2.f32 %v2406_v10  ;;  %v1086_v34 = vadd.f32 1.0, %v3137_v11  ;;  %v5200_v30 = vunpack.c.l.bf16 %v3642_v25  ;;  %v2369_v39 = vmul.f32 -1.442695, %v831_v51 }
 0x113   : > { %v3141_v50 = vpop.eup %3140  ;;  %3160 = vpow2.f32 %v2391_v54  ;;  %v5201_v24 = vunpack.c.h.bf16 %v3642_v25  ;;  %v5202_v14 = vunpack.c.l.bf16 %v3661_v38  ;;  %v861_v19 = vadd.f32 %v4052_v5, %v773_v58 }
 0x114   : > { %v752_v63 = vpop.xlane.xlu0 %751  ;;  %v3143_v52 = vpop.eup %3142  ;;  %v1297_v55 = vmul.f32 %v3139_v42, %v5200_v30  ;;  %3162 = vrcp.f32 %v1108_v44  ;;  %v4518_v10 = vadd.f32 %v4398_v43, %v1328_v12  ;;  %v2354_v1 = vmul.f32 -1.442695, %v816_v40 }
 0x115   : > { %v3145_v23 = vpop.eup %3144  ;;  %v1298_v48 = vmul.f32 %v3139_v42, %v5201_v24  ;;  %v1267_v32 = vmul.f32 %v3141_v50, %v5202_v14  ;;  %3164 = vpow2.f32 %v2384_v15  ;;  %v1071_v26 = vadd.f32 1.0, %v3143_v52  ;;  %v731_v60 = vpop.xlane.xlu1 %730 }
 0x116   : > { %v3147_v2 = vpop.eup %3146  ;;  %3166 = vrcp.f32 %v1101_v27  ;;  %v5203_v36 = vunpack.c.h.bf16 %v3661_v38  ;;  %v5204_v25 = vunpack.c.l.bf16 %v3664_v56  ;;  %v5205_v54 = vunpack.c.h.bf16 %v3664_v56 }
 0x117   : > { %v3149_v49 = vpop.eup %3148  ;;  %3168 = vrcp.f32 %v1086_v34  ;;  %v4527_v31 = vadd.f32 %v4413_v61, %v1297_v55  ;;  %v1116_v43 = vadd.f32 1.0, %v3147_v2  ;;  %v839_v44 = vadd.f32 %v4052_v5, %v707_v47 }
 0x118   : > { %v3151_v3 = vpop.eup %3150  ;;  %v1268_v46 = vmul.f32 %v3141_v50, %v5203_v36  ;;  %v1357_v9 = vmul.f32 %v3145_v23, %v5204_v25  ;;  %v1358_v11 = vmul.f32 %v3145_v23, %v5205_v54  ;;  %3170 = vpow2.f32 %v2369_v39  ;;  %v686_v51 = vpop.xlane.xlu0 %685 }
 0x119   : > { %v3153_v58 = vpop.eup %3152  ;;  %v4531_v38 = vadd.f32 %v4416_v28, %v1298_v48  ;;  %v4534_v15 = vadd.f32 %v4456_v29, %v1267_v32  ;;  %v2399_v56 = vmul.f32 -1.442695, %v861_v19  ;;  %v824_v50 = vadd.f32 %v4052_v5, %v662_v37 }
 0x11a   : > { %v3155_v42 = vpop.eup %3154  ;;  %v5206_v12 = vunpack.c.l.bf16 %v3675_v45  ;;  %v5207_v27 = vunpack.c.h.bf16 %v3675_v45  ;;  %3172 = vrcp.f32 %v1071_v26  ;;  %v1094_v47 = vadd.f32 1.0, %v3151_v3 }
 0x11b   : > { %v3157_v53 = vpop.eup %3156  ;;  %v4542_v52 = vadd.f32 %v4459_v35, %v1268_v46  ;;  %v4545_v28 = vadd.f32 %v4429_v7, %v1357_v9  ;;  %v4548_v29 = vadd.f32 %v4431_v21, %v1358_v11  ;;  %3174 = vpow2.f32 %v2354_v1  ;;  %v710_v21 = vpop.xlane.xlu1 %709 }
 0x11c   : > { %v1313_v61 = vmul.f32 %v3149_v49, %v5206_v12  ;;  %v1314_v40 = vmul.f32 %v3149_v49, %v5207_v27  ;;  %v3159_v37 = vpop.eup %3158  ;;  %v5208_v34 = vunpack.c.l.bf16 %v3686_v62  ;;  %3176 = vrcp.f32 %v1116_v43  ;;  %v776_v49 = vpop.xlane.xlu0 %775 }
 0x11d   : > { %v2377_v30 = vmul.f32 -1.442695, %v839_v44  ;;  %v869_v45 = vadd.f32 %v4052_v5, %v797_v6  ;;  %v3161_v55 = vpop.eup %3160  ;;  %v5209_v39 = vunpack.c.h.bf16 %v3686_v62  ;;  %v5210_v2 = vunpack.c.l.bf16 %v3699_v33 }
 0x11e   : > { %v1283_v23 = vmul.f32 %v3153_v58, %v5208_v34  ;;  %v1079_v24 = vadd.f32 1.0, %v3157_v53  ;;  %v2362_v48 = vmul.f32 -1.442695, %v824_v50  ;;  %v3163_v14 = vpop.eup %3162  ;;  %v4558_v32 = vadd.f32 %v4479_v22, %v1313_v61 }
 0x11f   : > { %v1284_v35 = vmul.f32 %v3153_v58, %v5209_v39  ;;  %v1373_v7 = vmul.f32 %v3155_v42, %v5210_v2  ;;  %v4561_v19 = vadd.f32 %v4482_v8, %v1314_v40  ;;  %3178 = vrcp.f32 %v1094_v47  ;;  %v3165_v26 = vpop.eup %3164  ;;  %v800_v50 = vpop.xlane.xlu1 %799 }
 0x120   : > { %v854_v6 = vadd.f32 %v4052_v5, %v752_v63  ;;  %v5211_v62 = vunpack.c.h.bf16 %v3699_v33  ;;  %v1124_v3 = vadd.f32 1.0, %v3159_v37  ;;  %3180 = vpow2.f32 %v2399_v56  ;;  %v3167_v46 = vpop.eup %3166  ;;  %v755_v40 = vpop.xlane.xlu0 %754 }
 0x121   : > { %v832_v36 = vadd.f32 %v4052_v5, %v686_v51  ;;  %v4568_v25 = vadd.f32 %v4444_v0, %v1283_v23  ;;  %v1109_v22 = vadd.f32 1.0, %v3161_v55  ;;  %3182 = vpow2.f32 %v2377_v30  ;;  %v3169_v9 = vpop.eup %3168 }
 0x122   : > { %v1374_v1 = vmul.f32 %v3155_v42, %v5211_v62  ;;  %v2407_v8 = vmul.f32 -1.442695, %v869_v45  ;;  %v4571_v54 = vadd.f32 %v4447_v41, %v1284_v35  ;;  %v4574_v63 = vadd.f32 %v4503_v4, %v1373_v7  ;;  %v3171_v58 = vpop.eup %3170 }
 0x123   : > { %v5212_v33 = vunpack.c.l.bf16 %v3708_v57  ;;  %3184 = vrcp.f32 %v1079_v24  ;;  %v5213_v43 = vunpack.c.h.bf16 %v3708_v57  ;;  %v1102_v0 = vadd.f32 1.0, %v3165_v26  ;;  %v5218_v24 = vld [vmem:[#allocation4_spill] sm:$0xff]  ;;  %v5221_v26 = vld [vmem:[#allocation5_spill] sm:$0xff] }
 0x124   : > { %3186 = vpow2.f32 %v2362_v48  ;;  %v847_v51 = vadd.f32 %v4052_v5, %v731_v60  ;;  %v5214_v42 = vunpack.c.l.bf16 %v3727_v17  ;;  %v2370_v41 = vmul.f32 -1.442695, %v832_v36  ;;  %v3173_v53 = vpop.eup %3172 }
 0x125   : > { %v1343_v11 = vmul.f32 %v3163_v14, %v5212_v33  ;;  %v1344_v44 = vmul.f32 %v3163_v14, %v5213_v43  ;;  %3188 = vrcp.f32 %v1124_v3  ;;  %v840_v4 = vadd.f32 %v4052_v5, %v710_v21  ;;  %v3175_v47 = vpop.eup %3174 }
 0x126   : > { %v1329_v56 = vmul.f32 %v3167_v46, %v5214_v42  ;;  %v4585_v12 = vadd.f32 %v4505_v59, %v1374_v1  ;;  %v5215_v61 = vunpack.c.h.bf16 %v3727_v17  ;;  %3190 = vrcp.f32 %v1109_v22  ;;  %v3177_v30 = vpop.eup %3176 }
 0x127   : > { %v2392_v27 = vmul.f32 -1.442695, %v854_v6  ;;  %v4590_v60 = vadd.f32 %v4468_v13, %v1343_v11  ;;  %v5216_v37 = vunpack.c.l.bf16 %v3730_v16  ;;  %v1087_v23 = vadd.f32 1.0, %v3171_v58  ;;  %v5224_v11 = vld [vmem:[#allocation6_spill] sm:$0xff] }
 0x128   : > { %v1330_v57 = vmul.f32 %v3167_v46, %v5215_v61  ;;  %3192 = vpow2.f32 %v2407_v8  ;;  %v4595_v45 = vadd.f32 %v4471_v20, %v1344_v44  ;;  %v1072_v59 = vadd.f32 1.0, %v3175_v47 }
 0x129   : > { %v1299_v34 = vmul.f32 %v3169_v9, %v5216_v37  ;;  %3194 = vrcp.f32 %v1102_v0  ;;  %v2385_v17 = vmul.f32 -1.442695, %v847_v51  ;;  %v4598_v55 = vadd.f32 %v4508_v18, %v1329_v56  ;;  %v3179_v2 = vpop.eup %3178 }
 0x12a   : > { %v5217_v39 = vunpack.c.h.bf16 %v3730_v16  ;;  %3196 = vpow2.f32 %v2370_v41  ;;  %v2378_v13 = vmul.f32 -1.442695, %v840_v4  ;;  %v4603_v7 = vadd.f32 %v4518_v10, %v1330_v57  ;;  %v3181_v6 = vpop.eup %3180  ;;  %v779_v10 = vpop.xlane.xlu1 %778 }
 0x12b   : > { %v5219_v48 = vunpack.c.l.bf16 %v5218_v24  ;;  %v5220_v20 = vunpack.c.h.bf16 %v5218_v24  ;;  %3198 = vrcp.f32 %v1072_v59  ;;  %v4610_v18 = vadd.f32 %v4527_v31, %v1299_v34  ;;  %v3183_v36 = vpop.eup %3182 }
 0x12c   : > { %v1300_v35 = vmul.f32 %v3169_v9, %v5217_v39  ;;  %v5222_v16 = vunpack.c.l.bf16 %v5221_v26  ;;  %v5223_v1 = vunpack.c.h.bf16 %v5221_v26  ;;  %3200 = vrcp.f32 %v1087_v23  ;;  %v734_v9 = vpop.xlane.xlu0 %733 }
 0x12d   : > { %v1269_v21 = vmul.f32 %v3173_v53, %v5219_v48  ;;  %v1270_v14 = vmul.f32 %v3173_v53, %v5220_v20  ;;  %3202 = vpow2.f32 %v2385_v17  ;;  %v862_v46 = vadd.f32 %v4052_v5, %v776_v49  ;;  %v3185_v33 = vpop.eup %3184  ;;  %v5233_v20 = vld [vmem:[#allocation9_spill] sm:$0xff] }
 0x12e   : > { %v1359_v62 = vmul.f32 %v3177_v30, %v5222_v16  ;;  %v1360_v3 = vmul.f32 %v3177_v30, %v5223_v1  ;;  %v870_v22 = vadd.f32 %v4052_v5, %v800_v50  ;;  %v855_v8 = vadd.f32 %v4052_v5, %v755_v40  ;;  %v3187_v51 = vpop.eup %3186  ;;  %v803_v34 = vpop.xlane.xlu1 %802  ;;  %v5227_v30 = vld [vmem:[#allocation7_spill] sm:$0xff] }
 0x12f   : > { %v4620_v31 = vadd.f32 %v4531_v38, %v1300_v35  ;;  %v5225_v58 = vunpack.c.l.bf16 %v5224_v11  ;;  %v5226_v44 = vunpack.c.h.bf16 %v5224_v11  ;;  %3204 = vpow2.f32 %v2378_v13  ;;  %v3189_v41 = vpop.eup %3188  ;;  %v5230_v35 = vld [vmem:[#allocation8_spill] sm:$0xff] }
 0x130   : > { %v1390_v42 = vadd.f32 %v4534_v15, %v1269_v21  ;;  %v1403_v49 = vadd.f32 %v4542_v52, %v1270_v14  ;;  %3206 = vpow2.f32 %v2392_v27  ;;  %v863_v56 = vadd.f32 %v4052_v5, %v779_v10  ;;  %v3191_v61 = vpop.eup %3190 }
 0x131   : > { %v1315_v43 = vmul.f32 %v3179_v2, %v5225_v58  ;;  %v1316_v0 = vmul.f32 %v3179_v2, %v5226_v44  ;;  %v4630_v4 = vadd.f32 %v4545_v28, %v1359_v62  ;;  %v1095_v38 = vadd.f32 1.0, %v3183_v36 }
 0x132   : > { %v1080_v50 = vadd.f32 1.0, %v3187_v51  ;;  %v848_v53 = vadd.f32 %v4052_v5, %v734_v9  ;;  %v4634_v57 = vadd.f32 %v4548_v29, %v1360_v3  ;;  %v2400_v40 = vmul.f32 -1.442695, %v862_v46  ;;  %v3193_v52 = vpop.eup %3192 }
 0x133   : > { %v2408_v47 = vmul.f32 -1.442695, %v870_v22  ;;  %v4636_v15 = vmul.f32 -1.442695, %v855_v8  ;;  %v4639_v27 = vadd.f32 %v4558_v32, %v1315_v43  ;;  %v4642_v37 = vadd.f32 %v4561_v19, %v1316_v0  ;;  %v3195_v23 = vpop.eup %3194  ;;  %v758_v32 = vpop.xlane.xlu0 %757  ;;  %v5236_v22 = vld [vmem:[#allocation12_spill] sm:$0xff] }
 0x134   : > { %v1117_v28 = vadd.f32 1.0, %v3181_v6  ;;  %3208 = vrcp.f32 %v1080_v50  ;;  %v5228_v59 = vunpack.c.l.bf16 %v5227_v30  ;;  %v5229_v29 = vunpack.c.h.bf16 %v5227_v30  ;;  %v3197_v48 = vpop.eup %3196 }
 0x135   : > { %v5231_v13 = vunpack.c.l.bf16 %v5230_v35  ;;  %v4650_v24 = vmul.f32 -1.442695, %v863_v56  ;;  %v5232_v19 = vunpack.c.h.bf16 %v5230_v35  ;;  %v5234_v14 = vunpack.c.l.bf16 %v5233_v20  ;;  %v3199_v16 = vpop.eup %3198 }
 0x136   : > { %v1285_v17 = vmul.f32 %v3185_v33, %v5228_v59  ;;  %v1286_v39 = vmul.f32 %v3185_v33, %v5229_v29  ;;  %3210 = vrcp.f32 %v1095_v38  ;;  %v2386_v26 = vmul.f32 -1.442695, %v848_v53  ;;  %v3201_v46 = vpop.eup %3200  ;;  %v5242_v29 = vld [vmem:[#allocation11_spill] sm:$0xff] }
 0x137   : > { %v1375_v2 = vmul.f32 %v3189_v41, %v5231_v13  ;;  %v1376_v21 = vmul.f32 %v3189_v41, %v5232_v19  ;;  %v1345_v6 = vmul.f32 %v3191_v61, %v5234_v14  ;;  %v5235_v62 = vunpack.c.h.bf16 %v5233_v20  ;;  %v3203_v43 = vpop.eup %3202 }
 0x138   : > { %v1125_v3 = vadd.f32 1.0, %v3193_v52  ;;  %v1088_v10 = vadd.f32 1.0, %v3197_v48  ;;  %v871_v36 = vadd.f32 %v4052_v5, %v803_v34  ;;  %v5237_v8 = vunpack.c.l.bf16 %v5236_v22  ;;  %v806_v52 = vpop.xlane.xlu1 %805 }
 0x139   : > { %v1346_v1 = vmul.f32 %v3191_v61, %v5235_v62  ;;  %v5238_v33 = vunpack.c.h.bf16 %v5236_v22  ;;  %3212 = vrcp.f32 %v1117_v28  ;;  %v856_v58 = vadd.f32 %v4052_v5, %v758_v32  ;;  %v3205_v56 = vpop.eup %3204 }
 0x13a   : > { %v1271_v9 = vmul.f32 %v3199_v16, %v5237_v8  ;;  %v1416_v44 = vadd.f32 %v4568_v25, %v1285_v17  ;;  %v1429_v0 = vadd.f32 %v4571_v54, %v1286_v39  ;;  %v4667_v51 = vadd.f32 %v4574_v63, %v1375_v2  ;;  %v3207_v53 = vpop.eup %3206  ;;  %v5239_v63 = vld [vmem:[#allocation10_spill] sm:$0xff]  ;;  %v782_v17 = vpop.xlane.xlu0 %781 }
 0x13b   : > { %v1272_v11 = vmul.f32 %v3199_v16, %v5238_v33  ;;  %3214 = vrcp.f32 %v1088_v10  ;;  %v4670_v41 = vadd.f32 %v4585_v12, %v1376_v21  ;;  %v4673_v38 = vadd.f32 %v4590_v60, %v1345_v6 }
 0x13c   : > { %3216 = vpow2.f32 %v2400_v40  ;;  %v4676_v61 = vadd.f32 %v4595_v45, %v1346_v1  ;;  %v1391_v25 = vadd.f32 %v1390_v42, %v1271_v9  ;;  %v1096_v54 = vadd.f32 1.0, %v3205_v56 }
 0x13d   : > { %v1404_v50 = vadd.f32 %v1403_v49, %v1272_v11  ;;  %3218 = vrcp.f32 %v1125_v3  ;;  %v5240_v28 = vunpack.c.l.bf16 %v5239_v63  ;;  %v5241_v30 = vunpack.c.h.bf16 %v5239_v63  ;;  %v5254_v63 = vld [vmem:[#allocation13_spill] sm:$0xff] }
 0x13e   : > { %v1103_v59 = vadd.f32 1.0, %v3203_v43  ;;  %3220 = vpow2.f32 %v2386_v26  ;;  %v2409_v49 = vmul.f32 -1.442695, %v871_v36  ;;  %v4682_v40 = vmul.f32 -1.442695, %v856_v58  ;;  %v3209_v45 = vpop.eup %3208  ;;  %v5251_v43 = vld [vmem:[#allocation19_spill] sm:$0xff] }
 0x13f   : > { %v1331_v34 = vmul.f32 %v3195_v23, %v5240_v28  ;;  %v1332_v12 = vmul.f32 %v3195_v23, %v5241_v30  ;;  %v1405_v60 = vrot.slane %v1404_v50, 4  ;;  %3222 = vrcp.f32 %v1096_v54  ;;  %v5245_v23 = vld [vmem:[#allocation15_spill] sm:$0xff] }
 0x140   : > { %v5243_v42 = vunpack.c.l.bf16 %v5242_v29  ;;  %v5244_v35 = vunpack.c.h.bf16 %v5242_v29  ;;  %v1110_v2 = vadd.f32 1.0, %v3207_v53  ;;  %v872_v32 = vadd.f32 %v4052_v5, %v806_v52  ;;  %v3211_v6 = vpop.eup %3210 }
 0x141   : > { %v1392_v48 = vrot.slane %v1391_v25, 4  ;;  %v5246_v19 = vunpack.c.l.bf16 %v5245_v23  ;;  %v5247_v20 = vunpack.c.h.bf16 %v5245_v23  ;;  %3224 = vpow2.f32 %v2408_v47 }
 0x142   : > { %v1301_v39 = vmul.f32 %v3201_v46, %v5243_v42  ;;  %v1302_v13 = vmul.f32 %v3201_v46, %v5244_v35  ;;  %v4694_v26 = vadd.f32 %v4598_v55, %v1331_v34  ;;  %v4697_v16 = vadd.f32 %v4603_v7, %v1332_v12  ;;  %v5248_v7 = vld [vmem:[#allocation14_spill] sm:$0xff] }
 0x143   : > { %v1287_v21 = vmul.f32 %v3209_v45, %v5246_v19  ;;  %v1288_v14 = vmul.f32 %v3209_v45, %v5247_v20  ;;  %3226 = vrcp.f32 %v1103_v59  ;;  %v864_v62 = vadd.f32 %v4052_v5, %v782_v17  ;;  %v3213_v36 = vpop.eup %3212 }
 0x144   : > { %v1406_v1 = vadd.f32 %v1405_v60, %v1404_v50  ;;  %3228 = vpow2.f32 %v4636_v15  ;;  %v1442_v46 = vadd.f32 %v4610_v18, %v1301_v39  ;;  %v1455_v47 = vadd.f32 %v4620_v31, %v1302_v13  ;;  %v5257_v13 = vld [vmem:[#allocation20_spill] sm:$0xff] }
 0x145   : > { %v1417_v3 = vadd.f32 %v1416_v44, %v1287_v21  ;;  %v1430_v10 = vadd.f32 %v1429_v0, %v1288_v14  ;;  %3230 = vrcp.f32 %v1110_v2  ;;  %v4703_v22 = vmul.f32 -1.442695, %v872_v32  ;;  %v3215_v55 = vpop.eup %3214 }
 0x146   : > { %v1393_v8 = vadd.f32 %v1392_v48, %v1391_v25  ;;  %v5249_v9 = vunpack.c.h.bf16 %v5248_v7  ;;  %3232 = vpow2.f32 %v4650_v24  ;;  %v3217_v5 = vpop.eup %3216  ;;  %v5250_v58 = vunpack.c.l.bf16 %v5248_v7 }
 0x147   : > { %v1431_v11 = vrot.slane %v1430_v10, 4  ;;  %v5252_v44 = vunpack.c.l.bf16 %v5251_v43  ;;  %v5253_v31 = vunpack.c.h.bf16 %v5251_v43  ;;  %v2402_v56 = vmul.f32 -1.442695, %v864_v62  ;;  %v4714_v50 = vpop.eup %3218  ;;  %v5260_v62 = vld [vmem:[#allocation16_spill] sm:$0xff] }
 0x148   : > { %v1318_v33 = vmul.f32 %v3211_v6, %v5249_v9  ;;  %v1317_v15 = vmul.f32 %v3211_v6, %v5250_v58  ;;  %v1407_v53 = vrot.slane %v1406_v1, 2  ;;  %v1418_v25 = vrot.slane %v1417_v3, 4  ;;  %v3221_v52 = vpop.eup %3220 }
 0x149   : > { %v1303_v18 = vmul.f32 %v3215_v55, %v5252_v44  ;;  %v1304_v0 = vmul.f32 %v3215_v55, %v5253_v31  ;;  %v1432_v54 = vadd.f32 %v1431_v11, %v1430_v10  ;;  %3234 = vpow2.f32 %v2409_v49  ;;  %v3223_v60 = vpop.eup %3222  ;;  %v5262_v44 = vld [vmem:[#allocation18_spill] sm:$0xff] }
 0x14a   : > { %v5255_v24 = vunpack.c.l.bf16 %v5254_v63  ;;  %v5256_v34 = vunpack.c.h.bf16 %v5254_v63  ;;  %v1394_v17 = vrot.slane %v1393_v8, 2  ;;  %v1481_v45 = vadd.f32 %v4642_v37, %v1318_v33 }
 0x14b   : > { %v1443_v12 = vadd.f32 %v1442_v46, %v1303_v18  ;;  %v1456_v59 = vadd.f32 %v1455_v47, %v1304_v0  ;;  %v1433_v29 = vrot.slane %v1432_v54, 2  ;;  %v1118_v42 = vadd.f32 1.0, %v3217_v5  ;;  %v3225_v23 = vpop.eup %3224 }
 0x14c   : > { %v1361_v28 = vmul.f32 %v3213_v36, %v5255_v24  ;;  %v4720_v30 = vmul.f32 %v3213_v36, %v5256_v34  ;;  %v5258_v49 = vunpack.c.l.bf16 %v5257_v13  ;;  %v5259_v32 = vunpack.c.h.bf16 %v5257_v13 }
 0x14d   : > { %v1444_v39 = vrot.slane %v1443_v12, 4  ;;  %v1457_v35 = vrot.slane %v1456_v59, 4  ;;  %v1468_v19 = vadd.f32 %v4639_v27, %v1317_v15  ;;  %v1419_v21 = vadd.f32 %v1418_v25, %v1417_v3  ;;  %v3227_v6 = vpop.eup %3226 }
 0x14e   : > { %v1319_v2 = vmul.f32 %v3223_v60, %v5258_v49  ;;  %v1320_v48 = vmul.f32 %v3223_v60, %v5259_v32  ;;  %v1104_v20 = vadd.f32 1.0, %v3221_v52  ;;  %v1408_v14 = vadd.f32 %v1407_v53, %v1406_v1  ;;  %v3229_v55 = vpop.eup %3228 }
 0x14f   : > { %v4729_v37 = vadd.f32 %v4630_v4, %v1361_v28  ;;  %v5261_v10 = vunpack.c.l.bf16 %v5260_v62  ;;  %v1458_v46 = vadd.f32 %v1457_v35, %v1456_v59  ;;  %v1445_v7 = vadd.f32 %v1444_v39, %v1443_v12  ;;  %v4734_v5 = vpop.eup %3230 }
 0x150   : > { %v1482_v47 = vadd.f32 %v1481_v45, %v1320_v48  ;;  %v1469_v9 = vadd.f32 %v1468_v19, %v1319_v2  ;;  %v1409_v33 = vrot.slane %v1408_v14, 1  ;;  %v1434_v11 = vadd.f32 %v1433_v29, %v1432_v54  ;;  %v3233_v58 = vpop.eup %3232 }
 0x151   : > { %v1377_v36 = vmul.f32 %v4714_v50, %v5261_v10  ;;  %v1395_v27 = vadd.f32 %v1394_v17, %v1393_v8  ;;  %3236 = vrcp.f32 %v1118_v42  ;;  %v1126_v1 = vadd.f32 1.0, %v3225_v23 }
 0x152   : > { %v1483_v3 = vrot.slane %v1482_v47, 4  ;;  %v1420_v4 = vrot.slane %v1419_v21, 2  ;;  %3238 = vrcp.f32 %v1104_v20  ;;  %v1410_v15 = vadd.f32 %v1409_v33, %v1408_v14 }
 0x153   : > { %v1435_v43 = vrot.slane %v1434_v11, 1  ;;  %v5263_v18 = vunpack.c.l.bf16 %v5262_v44  ;;  %v1111_v0 = vadd.f32 1.0, %v3229_v55  ;;  %v1459_v53 = vrot.slane %v1458_v46, 2  ;;  %v3235_v52 = vpop.eup %3234 }
 0x154   : > { %v1484_v25 = vadd.f32 %v1483_v3, %v1482_v47  ;;  %v1446_v54 = vrot.slane %v1445_v7, 2  ;;  %v1470_v63 = vrot.slane %v1469_v9, 4  ;;  %3240 = vpow2.f32 %v4682_v40 }
 0x155   : > { %v1333_v31 = vmul.f32 %v3227_v6, %v5263_v18  ;;  %v1436_v8 = vadd.f32 %v1435_v43, %v1434_v11  ;;  %v1119_v24 = vadd.f32 1.0, %v3233_v58  ;;  %3242 = vpow2.f32 %v4703_v22 }
 0x156   : > { %v1460_v28 = vadd.f32 %v1459_v53, %v1458_v46  ;;  %v1485_v34 = vrot.slane %v1484_v25, 2  ;;  %v1421_v12 = vadd.f32 %v1420_v4, %v1419_v21  ;;  %3244 = vpow2.f32 %v2402_v56 }
 0x157   : > { %v1595_v59 = vmul.f32 0.015625, %v1410_v15  ;;  %v1597_v60 = vmul.f32 0.015625, %v1436_v8  ;;  %v5264_v17 = vunpack.c.h.bf16 %v5262_v44  ;;  %v1127_v29 = vadd.f32 1.0, %v3235_v52 }
 0x158   : > { %v1461_v42 = vrot.slane %v1460_v28, 1  ;;  %v1486_v39 = vadd.f32 %v1485_v34, %v1484_v25  ;;  %3246 = vrcp.f32 %v1126_v1  ;;  %v1447_v35 = vadd.f32 %v1446_v54, %v1445_v7 }
 0x159   : > { %v1334_v45 = vmul.f32 %v3227_v6, %v5264_v17  ;;  %v1854_v40 = vsel %vm1840_vm0, %v1597_v60, %v1595_v59  ;;  %v1471_v13 = vadd.f32 %v1470_v63, %v1469_v9  ;;  %3248 = vrcp.f32 %v1111_v0  ;;  %v5266_v9 = vld [vmem:[#allocation25_spill] sm:$0xff] }
 0x15a   : > { %v1462_v22 = vadd.f32 %v1461_v42, %v1460_v28  ;;  %v1487_v49 = vrot.slane %v1486_v39, 1  ;;  %v1396_v2 = vrot.slane %v1395_v27, 1  ;;  %3250 = vrcp.f32 %v1119_v24 }
 0x15b   : > { %v1422_v32 = vrot.slane %v1421_v12, 1  ;;  %v1448_v56 = vrot.slane %v1447_v35, 1  ;;  %v1472_v48 = vrot.slane %v1471_v13, 2  ;;  %v3237_v23 = vpop.eup %3236  ;;  %v4745_v19 = vadd.f32 %v4634_v57, %v4720_v30 }
 0x15c   : > { %v5265_v21 = vunpack.c.h.bf16 %v5260_v62  ;;  %v4751_v14 = vadd.f32 %v4667_v51, %v1377_v36  ;;  %3252 = vrcp.f32 %v1127_v29  ;;  %v3239_v6 = vpop.eup %3238  ;;  %v1494_v10 = vadd.f32 %v4694_v26, %v1333_v31  ;;  %v5272_v29 = vld [vmem:[#allocation21_spill] sm:$0xff] }
 0x15d   : > { %v1488_v46 = vadd.f32 %v1487_v49, %v1486_v39  ;;  %v1599_v47 = vmul.f32 0.015625, %v1462_v22  ;;  %v1473_v55 = vadd.f32 %v1472_v48, %v1471_v13  ;;  %v1507_v7 = vadd.f32 %v4697_v16, %v1334_v45  ;;  %v5269_v16 = vld [vmem:[#allocation17_spill] sm:$0xff] }
 0x15e   : > { %v1378_v20 = vmul.f32 %v4714_v50, %v5265_v21  ;;  %v5267_v33 = vunpack.c.l.bf16 %v5266_v9  ;;  %v5268_v30 = vunpack.c.h.bf16 %v5266_v9  ;;  %v1397_v11 = vadd.f32 %v1396_v2, %v1395_v27  ;;  %v3241_v50 = vpop.eup %3240  ;;  %v5275_v2 = vld [vmem:[#allocation22_spill] sm:$0xff] }
 0x15f   : > { %v1601_v3 = vmul.f32 0.015625, %v1488_v46  ;;  %v1855_v51 = vsel %vm1842_vm1, %v1599_v47, %v1854_v40  ;;  %v1423_v36 = vadd.f32 %v1422_v32, %v1421_v12  ;;  %v1449_v1 = vadd.f32 %v1448_v56, %v1447_v35  ;;  %v3243_v58 = vpop.eup %3242 }
 0x160   : > { %v1335_v57 = vmul.f32 %v3239_v6, %v5267_v33  ;;  %v1336_v62 = vmul.f32 %v3239_v6, %v5268_v30  ;;  %v1112_v15 = vadd.f32 1.0, %v3241_v50  ;;  %v1474_v43 = vrot.slane %v1473_v55, 1  ;;  %v3245_v44 = vpop.eup %3244 }
 0x161   : > { %v5270_v18 = vunpack.c.l.bf16 %v5269_v16  ;;  %v5271_v0 = vunpack.c.h.bf16 %v5269_v16  ;;  %v1128_v53 = vadd.f32 1.0, %v3243_v58  ;;  %v4767_v25 = vsel %vm1844_vm2, %v1601_v3, %v1855_v51  ;;  %v5284_v51 = vld [vmem:[#allocation26_spill] sm:$0xff] }
 0x162   : > { %v1495_v26 = vadd.f32 %v1494_v10, %v1335_v57  ;;  %v1508_v4 = vadd.f32 %v1507_v7, %v1336_v62  ;;  %3254 = vrcp.f32 %v1112_v15  ;;  %v1120_v52 = vadd.f32 1.0, %v3245_v44  ;;  %v3247_v8 = vpop.eup %3246  ;;  %v5278_v10 = vld [vmem:[#allocation23_spill] sm:$0xff]  ;;  %v5281_v57 = vld [vmem:[#allocation24_spill] sm:$0xff] }
 0x163   : > { %v1347_v31 = vmul.f32 %v4734_v5, %v5270_v18  ;;  %v1348_v27 = vmul.f32 %v4734_v5, %v5271_v0  ;;  %v1475_v63 = vadd.f32 %v1474_v43, %v1473_v55  ;;  %3256 = vrcp.f32 %v1128_v53  ;;  %v3249_v12 = vpop.eup %3248 }
 0x164   : > { %v1509_v54 = vrot.slane %v1508_v4, 4  ;;  %v1496_v24 = vrot.slane %v1495_v26, 4  ;;  %v1594_v28 = vmul.f32 0.015625, %v1397_v11  ;;  %v1596_v34 = vmul.f32 0.015625, %v1423_v36  ;;  %v3251_v45 = vpop.eup %3250 }
 0x165   : > { %3258 = vrcp.f32 %v1120_v52  ;;  %v1598_v60 = vmul.f32 0.015625, %v1449_v1  ;;  %v1600_v17 = vmul.f32 0.015625, %v1475_v63  ;;  %v1519_v5 = vadd.f32 %v4673_v38, %v1347_v31 }
 0x166   : > { %v1510_v59 = vadd.f32 %v1509_v54, %v1508_v4  ;;  %v5273_v42 = vunpack.c.l.bf16 %v5272_v29  ;;  %v1497_v40 = vadd.f32 %v1496_v24, %v1495_v26  ;;  %v1841_v35 = vsel %vm1840_vm0, %v1596_v34, %v1594_v28  ;;  %v3253_v13 = vpop.eup %3252 }
 0x167   : > { %v5274_v22 = vunpack.c.h.bf16 %v5272_v29  ;;  %v5276_v32 = vunpack.c.l.bf16 %v5275_v2  ;;  %v1843_v21 = vsel %vm1842_vm1, %v1598_v60, %v1841_v35  ;;  %v5277_v6 = vunpack.c.h.bf16 %v5275_v2 }
 0x168   : > { %v1363_v39 = vmul.f32 %v3237_v23, %v5273_v42  ;;  %v1511_v48 = vrot.slane %v1510_v59, 2  ;;  %v5279_v46 = vunpack.c.l.bf16 %v5278_v10  ;;  %v1498_v55 = vrot.slane %v1497_v40, 2  ;;  %v5293_v42 = vld [vmem:[#allocation29_spill] sm:$0xff] }
 0x169   : > { %v1364_v49 = vmul.f32 %v3237_v23, %v5274_v22  ;;  %v1379_v56 = vmul.f32 %v3247_v8, %v5276_v32  ;;  %v1380_v38 = vmul.f32 %v3247_v8, %v5277_v6  ;;  %v1845_v7 = vsel %vm1844_vm2, %v1600_v17, %v1843_v21 }
 0x16a   : > { %v1349_v47 = vmul.f32 %v3249_v12, %v5279_v46  ;;  %v5280_v9 = vunpack.c.h.bf16 %v5278_v10  ;;  %v5282_v23 = vunpack.c.l.bf16 %v5281_v57  ;;  %v5283_v62 = vunpack.c.h.bf16 %v5281_v57 }
 0x16b   : > { %v1512_v50 = vadd.f32 %v1511_v48, %v1510_v59  ;;  %v1532_v3 = vadd.f32 %v4676_v61, %v1348_v27  ;;  %v5285_v36 = vunpack.c.h.bf16 %v5284_v51  ;;  %v1583_v58 = vadd.f32 %v4670_v41, %v1378_v20  ;;  %v5287_v20 = vld [vmem:[#allocation27_spill] sm:$0xff]  ;;  %v5290_v59 = vld [vmem:[#allocation28_spill] sm:$0xff] }
 0x16c   : > { %v1350_v33 = vmul.f32 %v3249_v12, %v5280_v9  ;;  %v1365_v30 = vmul.f32 %v3251_v45, %v5282_v23  ;;  %v1366_v11 = vmul.f32 %v3251_v45, %v5283_v62  ;;  %v1499_v26 = vadd.f32 %v1498_v55, %v1497_v40  ;;  %v3255_v61 = vpop.eup %3254 }
 0x16d   : > { %v1382_v1 = vmul.f32 %v3253_v13, %v5285_v36  ;;  %v1545_v4 = vadd.f32 %v4729_v37, %v1363_v39  ;;  %v5286_v15 = vunpack.c.l.bf16 %v5284_v51  ;;  %v1513_v44 = vrot.slane %v1512_v50, 1  ;;  %v3257_v41 = vpop.eup %3256 }
 0x16e   : > { %v1558_v16 = vadd.f32 %v4745_v19, %v1364_v49  ;;  %v1520_v18 = vadd.f32 %v1519_v5, %v1349_v47  ;;  %v1584_v31 = vadd.f32 %v1583_v58, %v1380_v38  ;;  %v1500_v0 = vrot.slane %v1499_v26, 1 }
 0x16f   : > { %v1381_v43 = vmul.f32 %v3253_v13, %v5286_v15  ;;  %v1571_v53 = vadd.f32 %v4751_v14, %v1379_v56  ;;  %v1533_v27 = vadd.f32 %v1532_v3, %v1350_v33  ;;  %v1514_v52 = vadd.f32 %v1513_v44, %v1512_v50  ;;  %v3259_v19 = vpop.eup %3258 }
 0x170   : > { %v1559_v54 = vadd.f32 %v1558_v16, %v1366_v11  ;;  %v1546_v63 = vadd.f32 %v1545_v4, %v1365_v30  ;;  %v5288_v8 = vunpack.c.l.bf16 %v5287_v20  ;;  %v5289_v24 = vunpack.c.h.bf16 %v5287_v20 }
 0x171   : > { %v1585_v34 = vadd.f32 %v1584_v31, %v1382_v1  ;;  %v1501_v12 = vadd.f32 %v1500_v0, %v1499_v26  ;;  %v5291_v60 = vunpack.c.h.bf16 %v5290_v59  ;;  %v1603_v45 = vmul.f32 0.015625, %v1514_v52 }
 0x172   : > { %v1351_v37 = vmul.f32 %v3255_v61, %v5288_v8  ;;  %v1352_v28 = vmul.f32 %v3255_v61, %v5289_v24  ;;  %v5292_v14 = vunpack.c.l.bf16 %v5290_v59  ;;  %v1572_v29 = vadd.f32 %v1571_v53, %v1381_v43 }
 0x173   : > { %v1384_v17 = vmul.f32 %v3257_v41, %v5291_v60  ;;  %v5294_v39 = vunpack.c.l.bf16 %v5293_v42  ;;  %v5295_v35 = vunpack.c.h.bf16 %v5293_v42  ;;  %v1857_v32 = vsel %vm1846_vm3, %v1603_v45, %v4767_v25  ;;  %v2551_v42 = vld [vmem:[%s4928_s5 + $0x48] sm:$0xff]  }
 0x174   : > { %v1383_v5 = vmul.f32 %v3257_v41, %v5292_v14  ;;  %v1534_v22 = vadd.f32 %v1533_v27, %v1352_v28  ;;  %v1521_v49 = vadd.f32 %v1520_v18, %v1351_v37  ;;  %v1602_v48 = vmul.f32 0.015625, %v1501_v12 }
 0x175   : > { %v1367_v40 = vmul.f32 %v3259_v19, %v5294_v39  ;;  %v1368_v13 = vmul.f32 %v3259_v19, %v5295_v35  ;;  %v1586_v2 = vadd.f32 %v1585_v34, %v1384_v17  ;;  %v2567_v39 = vld [vmem:[%s4928_s5 + $0xc8] sm:$0xff]  }
 0x176   : > { %v1573_v56 = vadd.f32 %v1572_v29, %v1383_v5  ;;  %v1535_v21 = vrot.slane %v1534_v22, 4  ;;  %v1522_v38 = vrot.slane %v1521_v49, 4  ;;  %v1847_v55 = vsel %vm1846_vm3, %v1602_v48, %v1845_v7  ;;  %v2416_v5 = vld [vmem:[%s4928_s5] sm:$0xff]   ;;  %v2559_v35 = vld [vmem:[%s4928_s5 + $0x88] sm:$0xff]   ;;  %v2545_v48 = vld [vmem:[%s4928_s5 + $0x18] sm:$0xff]  }
 0x177   : > { %v1560_v6 = vadd.f32 %v1559_v54, %v1368_v13  ;;  %v1547_v10 = vadd.f32 %v1546_v63, %v1367_v40  ;;  %v1587_v46 = vrot.slane %v1586_v2, 4  ;;  %v2558_v29 = vld [vmem:[%s4928_s5 + $0x80] sm:$0xff]   ;;  %v2543_v40 = vld [vmem:[%s4928_s5 + $0x8] sm:$0xff]   ;;  %v2552_v13 = vld [vmem:[%s4928_s5 + $0x50] sm:$0xff]  }
 0x178   : > { %v1574_v47 = vrot.slane %v1573_v56, 4  ;;  %v1536_v9 = vadd.f32 %v1535_v21, %v1534_v22  ;;  %v1523_v57 = vadd.f32 %v1522_v38, %v1521_v49  ;;  %v2568_v22 = vld [vmem:[%s4928_s5 + $0xd0] sm:$0xff]   ;;  %v2561_v21 = vld [vmem:[%s4928_s5 + $0x98] sm:$0xff]   ;;  %v2570_v38 = vld [vmem:[%s4928_s5 + $0xe0] sm:$0xff]  }
 0x179   : > { %v1561_v33 = vrot.slane %v1560_v6, 4  ;;  %v1548_v23 = vrot.slane %v1547_v10, 4  ;;  %v1588_v30 = vadd.f32 %v1587_v46, %v1586_v2  ;;  %v2544_v49 = vld [vmem:[%s4928_s5 + $0x10] sm:$0xff]   ;;  %v2562_v46 = vld [vmem:[%s4928_s5 + $0xa0] sm:$0xff]  }
 0x17a   : > { %v1575_v62 = vadd.f32 %v1574_v47, %v1573_v56  ;;  %v1537_v11 = vrot.slane %v1536_v9, 2  ;;  %v1524_v3 = vrot.slane %v1523_v57, 2  ;;  %v2560_v2 = vld [vmem:[%s4928_s5 + $0x90] sm:$0xff]   ;;  %v2569_v56 = vld [vmem:[%s4928_s5 + $0xd8] sm:$0xff]   ;;  %v2555_v47 = vld [vmem:[%s4928_s5 + $0x68] sm:$0xff]  }
 0x17b   : > { %v1562_v50 = vadd.f32 %v1561_v33, %v1560_v6  ;;  %v1549_v25 = vadd.f32 %v1548_v23, %v1547_v10  ;;  %v1589_v51 = vrot.slane %v1588_v30, 2  ;;  %v2554_v6 = vld [vmem:[%s4928_s5 + $0x60] sm:$0xff]   ;;  %v2563_v33 = vld [vmem:[%s4928_s5 + $0xa8] sm:$0xff]   ;;  %v2572_v23 = vld [vmem:[%s4928_s5 + $0xf0] sm:$0xff]  }
 0x17c   : > { %v1576_v36 = vrot.slane %v1575_v62, 2  ;;  %v1538_v1 = vadd.f32 %v1537_v11, %v1536_v9  ;;  %v1525_v26 = vadd.f32 %v1524_v3, %v1523_v57  ;;  %v2546_v10 = vld [vmem:[%s4928_s5 + $0x20] sm:$0xff]   ;;  %v2547_v9 = vld [vmem:[%s4928_s5 + $0x28] sm:$0xff]   ;;  %v2556_v57 = vld [vmem:[%s4928_s5 + $0x70] sm:$0xff]  }
 0x17d   : > { %v1563_v58 = vrot.slane %v1562_v50, 2  ;;  %v1550_v4 = vrot.slane %v1549_v25, 2  ;;  %v1590_v15 = vadd.f32 %v1589_v51, %v1588_v30  ;;  %v2548_v30 = vld [vmem:[%s4928_s5 + $0x30] sm:$0xff]   ;;  %v2557_v11 = vld [vmem:[%s4928_s5 + $0x78] sm:$0xff]   ;;  %v5296_v51 = vld [vmem:[#allocation3_spill] sm:$0xff] }
 0x17e   : > { %v1577_v43 = vadd.f32 %v1576_v36, %v1575_v62  ;;  %v1539_v44 = vrot.slane %v1538_v1, 1  ;;  %v1526_v16 = vrot.slane %v1525_v26, 1  ;;  %v2564_v62 = vld [vmem:[%s4928_s5 + $0xb0] sm:$0xff]   ;;  %v2549_v3 = vld [vmem:[%s4928_s5 + $0x38] sm:$0xff]   ;;  %v1814_v36 = vsub.s32 2, %v5296_v51 }
 0x17f   : > { %v1564_v7 = vadd.f32 %v1563_v58, %v1562_v50  ;;  %v1551_v18 = vadd.f32 %v1550_v4, %v1549_v25  ;;  %v1591_v31 = vrot.slane %v1590_v15, 1  ;;  %v2573_v50 = vld [vmem:[%s4928_s5 + $0xf8] sm:$0xff]   ;;  %v1818_v58 = vsub.s32 3, %v5296_v51 }
 0x180   : > { %v1578_v0 = vrot.slane %v1577_v43, 1  ;;  %v1540_v53 = vadd.f32 %v1539_v44, %v1538_v1  ;;  %v1527_v27 = vadd.f32 %v1526_v16, %v1525_v26  ;;  %v2565_v25 = vld [vmem:[%s4928_s5 + $0xb8] sm:$0xff]   ;;  %v1802_v1 = vld [vmem:[%s4927_s4] sm:$0xf]  ;;  %v5297_v26 = vsub.s32 0, %v5296_v51 }
 0x181   : > { %v1565_v61 = vrot.slane %v1564_v7, 1  ;;  %v1552_v52 = vrot.slane %v1551_v18, 1  ;;  %v1592_v54 = vadd.f32 %v1591_v31, %v1590_v15  ;;  %v1815_v15 = vrot.slane %v1802_v1, %v1814_v36 }
 0x182   : > { %v1579_v63 = vadd.f32 %v1578_v0, %v1577_v43  ;;  %v1605_v20 = vmul.f32 0.015625, %v1540_v53  ;;  %v1604_v37 = vmul.f32 0.015625, %v1527_v27  ;;  %v1807_v4 = vrot.slane %v1802_v1, %v5297_v26 }
 0x183   : > { %v1566_v41 = vadd.f32 %v1565_v61, %v1564_v7  ;;  %v1553_v8 = vadd.f32 %v1552_v52, %v1551_v18  ;;  %v1609_v24 = vmul.f32 0.015625, %v1592_v54  ;;  %v5298_v43 = vsub.s32 1, %v5296_v51 }
 0x184   : > { %v1608_v28 = vmul.f32 0.015625, %v1579_v63  ;;  %v1858_v12 = vsel %vm1848_vm4, %v1605_v20, %v1857_v32  ;;  %v1849_v59 = vsel %vm1848_vm4, %v1604_v37, %v1847_v55  ;;  %v2553_v32 = vld [vmem:[%s4928_s5 + $0x58] sm:$0xff]   ;;  %v2571_v55 = vld [vmem:[%s4928_s5 + $0xe8] sm:$0xff]   ;;  %v1819_v7 = vrot.slane %v1802_v1, %v1818_v58 }
 0x185   : > { %v1607_v34 = vmul.f32 0.015625, %v1566_v41  ;;  %v1606_v19 = vmul.f32 0.015625, %v1553_v8  ;;  %v1811_v44 = vrot.slane %v1802_v1, %v5298_v43 }
 0x187   : > { %v1859_v60 = vsel %vm1850_vm5, %v1607_v34, %v1858_v12  ;;  %v1851_v17 = vsel %vm1850_vm5, %v1606_v19, %v1849_v59 }
 0x188   : > { %v1860_v45 = vsel %vm1852_vm6, %v1609_v24, %v1859_v60  ;;  %v1853_v14 = vsel %vm1852_vm6, %v1608_v28, %v1851_v17  ;;  %v2411_v24 = vld [vmem:[%s4929_s6] ss:$0 sm:$0xff] }
 0x189   : > { %1927 = vmatprep.mubr.f32.mxu0 %v1860_v45  ;;  %1998 = vmatprep.mubr.f32.mxu1 %v1860_v45 }
 0x18a   : > { %1928 = vmatmul.mubr.f32.vlgmr.msra.gmra.mrb[0].mxu0 %v1853_v14  ;;  %1999 = vmatmul.mubr.f32.vlgmr.msra.gmra.mrb[0].mxu1 %v1853_v14 }
 0x18b   : > { %2775 = vmatpush3.bf16.msra.mxu0 %v2416_v5  ;;  %2807 = vmatpush3.bf16.msra.mxu1 %v2558_v29 }
 0x18c   : > { %2777 = vmatprep.subr.bf16.mxu0 %v2551_v42  ;;  %2809 = vmatprep.subr.bf16.mxu1 %v2567_v39 }
 0x18f   : > { %2779 = vmatpush3.bf16.msra.mxu0 %v2543_v40  ;;  %2811 = vmatpush3.bf16.msra.mxu1 %v2559_v35 }
 0x190   : > { %2781 = vmatprep.subr.bf16.mxu0 %v2552_v13  ;;  %2813 = vmatprep.subr.bf16.mxu1 %v2568_v22 }
 0x193   : > { %2783 = vmatpush3.bf16.msra.mxu0 %v2544_v49  ;;  %2815 = vmatpush3.bf16.msra.mxu1 %v2560_v2 }
 0x194   : > { %2785 = vmatprep.subr.bf16.mxu0 %v2553_v32  ;;  %2817 = vmatprep.subr.bf16.mxu1 %v2569_v56 }
 0x197   : > { %2787 = vmatpush3.bf16.msra.mxu0 %v2545_v48  ;;  %2819 = vmatpush3.bf16.msra.mxu1 %v2561_v21 }
 0x198   : > { %2789 = vmatprep.subr.bf16.mxu0 %v2554_v6  ;;  %2821 = vmatprep.subr.bf16.mxu1 %v2570_v38 }
 0x19b   : > { %2791 = vmatpush3.bf16.msra.mxu0 %v2546_v10  ;;  %2823 = vmatpush3.bf16.msra.mxu1 %v2562_v46 }
 0x19c   : > { %2793 = vmatprep.subr.bf16.mxu0 %v2555_v47  ;;  %2825 = vmatprep.subr.bf16.mxu1 %v2571_v55 }
 0x19f   : > { %2795 = vmatpush3.bf16.msra.mxu0 %v2547_v9  ;;  %2827 = vmatpush3.bf16.msra.mxu1 %v2563_v33 }
 0x1a0   : > { %2797 = vmatprep.subr.bf16.mxu0 %v2556_v57  ;;  %2829 = vmatprep.subr.bf16.mxu1 %v2572_v23 }
 0x1a3   : > { %2799 = vmatpush3.bf16.msra.mxu0 %v2548_v30  ;;  %2831 = vmatpush3.bf16.msra.mxu1 %v2564_v62 }
 0x1a4   : > { %2801 = vmatprep.subr.bf16.mxu0 %v2557_v11  ;;  %2833 = vmatprep.subr.bf16.mxu1 %v2573_v50 }
 0x1a7   : > { %2803 = vmatpush3.bf16.msra.mxu0 %v2549_v3  ;;  %2835 = vmatpush3.bf16.msra.mxu1 %v2565_v25 }
 0x25d   : > { %v1929_v16 = vpop.f32.mrb[0].mxu0  ;;  %v2000_v18 = vpop.f32.mrb[0].mxu1 }
 0x25e   : > { %v1930_v31 = vadd.f32 %v1929_v16, %v1807_v4  ;;  %v2001_v0 = vadd.f32 %v2000_v18, %v1815_v15  ;;  %v1931_v53 = vpop.f32.mrb[1].mxu0  ;;  %v2002_v61 = vpop.f32.mrb[1].mxu1 }
 0x25f   : > { %v1932_v27 = vadd.f32 %v1931_v53, %v1811_v44  ;;  %v2003_v52 = vadd.f32 %v2002_v61, %v1819_v7 }
 0x260   : > { %v2005_v41 = vmax.f32 %v1930_v31, 0.0  ;;  %v2007_v20 = vmax.f32 %v2001_v0, 0.0 }
 0x261   : > { %v2006_v54 = vmax.f32 %v1932_v27, 0.0  ;;  %v2008_v63 = vmax.f32 %v2003_v52, 0.0 }
 0x263   : > { %2208 = vmatprep.mubr.f32.mxu0 %v2006_v54  ;;  %2278 = vmatprep.mubr.f32.mxu1 %v2008_v63 }
 0x264   : > { %2209 = vmatmul.mubr.f32.vlgmr.msra.gmra.mrb[2].mxu0 %v2005_v41  ;;  %2279 = vmatmul.mubr.f32.vlgmr.msra.gmra.mrb[2].mxu1 %v2007_v20 }
 0x337   : > { %v2606_v8 = vpop.f32.mrb[2].mxu0  ;;  %v2641_v37 = vpop.f32.mrb[2].mxu1 }
 0x338   : > { %v2607_v28 = vpop.f32.mrb[3].mxu0  ;;  %v2642_v34 = vpop.f32.mrb[3].mxu1 }
 0x339   : > { %v2608_v12 = vadd.f32 %v2607_v28, %v2606_v8  ;;  %v2643_v19 = vadd.f32 %v2642_v34, %v2641_v37 }
 0x33b   : > { %v2211_v59 = vadd.f32 %v2608_v12, %v2411_v24 }
 0x33d   : > { %v2281_v60 = vadd.f32 %v2643_v19, %v2211_v59 }
 0x33f   : > { %2284 = vst [vmem:[%s282_s13] sm:$0xff] %v2281_v60 }
 0x340 PF: > { %s18_s26 = sadd.s32 1, %s3266_s26  }
 0x341   : > { %p15_p5 = scmp.ge.s32.totalorder %s18_s26, 4  }
 0x343   :  { %17 = sbr.rel (!%p15_p5) target bundleno = 2 (0x2), region = 78 }

</bundles_post_ra>
